<compile_context>
chip_gen: v7x
topology: tpu7x:2x2x1
jax: 0.10.0
libtpu: 0.0.40
codegen_flags: <defaults>
</compile_context>

<pallas_src>
import functools

import jax
import jax.numpy as jnp
from jax.experimental import pallas as pl
from jax.experimental.pallas import tpu as pltpu

# ----------------------------- config (small, synthetic) --------------------
B, C, H, W = 2, 4, 16, 16        # input  NCHW
K, PAD = 3, 1                    # 3x3 conv, same padding
F = 32                           # conv output channels (hidden features)
NUM_CLASSES = 5                  # num_classifier_classes > 1  -> softmax(dim=1)
HW = H * W
CKK = C * K * K
M = B * HW                       # all batch rows fed to the MXU in one pass
OUT_PAD = 128                    # lane-dense padded classifier width


# ----------------------------- Pallas kernel --------------------------------
def _stable_sigmoid(x):
    """sigmoid via exp(-|x|): no overflow; reciprocal lowers to the EUP."""
    z = jnp.exp(-jnp.abs(x))
    inv = pl.reciprocal(1.0 + z, approx=True)
    return jnp.where(x >= 0, inv, z * inv)


def abn_kernel(patches_ref, w1_ref, b1_ref, watt_ref, batt_ref,
               wfc_ref, bfc_ref, out_ref, *, batch, hw, num_classes):
    # conv3x3 as one im2col matmul over ALL batch rows: [M, CKK] @ [CKK, F]
    # bf16 inputs, f32 accumulation on the MXU.
    feat = jnp.dot(patches_ref[...], w1_ref[...],
                   preferred_element_type=jnp.float32) + b1_ref[...]      # [M, F]
    feat = jnp.maximum(feat, 0.0)

    # attention branch: 1x1 conv F->1 + sigmoid (ABN attention map)
    att_logit = (jnp.sum(feat * watt_ref[...], axis=-1, keepdims=True)
                 + batt_ref[...])                                         # [M, 1]
    att = _stable_sigmoid(att_logit)

    # ABN attention application + per-sample global average pool over H*W
    feat_att = feat * (1.0 + att)                                         # [M, F]
    pooled = jnp.concatenate(
        [jnp.mean(feat_att[b * hw:(b + 1) * hw, :], axis=0, keepdims=True)
         for b in range(batch)],
        axis=0)                                                           # [B, F]

    # classifier for the whole batch in a single tiny matmul; N is padded to
    # 128 lanes so the writeback is one unmasked lane-dense store.  Padded bias
    # lanes are -1e30, so they contribute exp(.) = 0 to the softmax.
    logits = jnp.dot(pooled, wfc_ref[...],
                     preferred_element_type=jnp.float32) + bfc_ref[...]   # [B, OUT_PAD]

    # activation (gu.calc_preds): sigmoid if 1 class else softmax over classes
    if num_classes == 1:
        probs = _stable_sigmoid(logits)
    else:
        mx = jnp.max(logits, axis=-1, keepdims=True)
        e = jnp.exp(logits - mx)
        probs = e * pl.reciprocal(jnp.sum(e, axis=-1, keepdims=True), approx=True)

    out_ref[...] = probs.astype(out_ref.dtype)                            # [B, OUT_PAD]


def activation_net_abn(patches2d, w1, b1, watt, batt, wfc_pad, bfc_pad):
    """patches2d: [B*HW, CKK] bf16; returns probs [B, NUM_CLASSES] f32."""
    kernel = functools.partial(abn_kernel, batch=B, hw=HW, num_classes=NUM_CLASSES)

    def full(a):
        nd = a.ndim
        return pl.BlockSpec(a.shape, lambda i, _nd=nd: (0,) * _nd)

    args = (patches2d, w1, b1, watt, batt, wfc_pad, bfc_pad)
    out_pad = pl.pallas_call(
        kernel,
        out_shape=jax.ShapeDtypeStruct((B, OUT_PAD), jnp.float32),
        grid_spec=pltpu.PrefetchScalarGridSpec(
            num_scalar_prefetch=0,
            grid=(1,),                               # single step: whole problem at once
            in_specs=[full(a) for a in args],
            out_specs=pl.BlockSpec((B, OUT_PAD), lambda i: (0, 0)),
        ),
        compiler_params=pltpu.CompilerParams(dimension_semantics=("arbitrary",)),
    )(*args)
    return out_pad[:, :NUM_CLASSES]                  # slice off padded lanes


# ----------------------------- JAX glue --------------------------------------
def im2col_nchw(x, k=K, pad=PAD):
    """x: [B, C, H, W] -> patches [B, H*W, C*k*k] (channel-major, then ki, kj)."""
    b, c, h, w = x.shape
    xp = jnp.pad(x, ((0, 0), (0, 0), (pad, pad), (pad, pad)))
    cols = []
    for di in range(k):
        for dj in range(k):
            cols.append(xp[:, :, di:di + h, dj:dj + w])      # [B, C, H, W]
    p = jnp.stack(cols, axis=2)                              # [B, C, k*k, H, W]
    p = p.transpose(0, 3, 4, 1, 2)                           # [B, H, W, C, k*k]
    return p.reshape(b, h * w, c * k * k)


def reference_forward(patches_bf, w1_bf, b1, watt, batt, wfc, bfc):
    # reference uses the same bf16-rounded matmul inputs (f32 accumulation)
    p = patches_bf.astype(jnp.float32)
    wmat = w1_bf.astype(jnp.float32)
    feat = jnp.maximum(p @ wmat + b1, 0.0)                   # [B*HW, F]
    att = jax.nn.sigmoid(jnp.sum(feat * watt, axis=-1, keepdims=True) + batt)
    fa = feat * (1.0 + att)
    pooled = jnp.mean(fa.reshape(B, HW, F), axis=1)          # [B, F]
    logits = pooled @ wfc + bfc
    return jax.nn.softmax(logits, axis=-1) if NUM_CLASSES > 1 else jax.nn.sigmoid(logits)


if __name__ == "__main__":
    key = jax.random.PRNGKey(0)
    kx, k1, k2, k3, k4 = jax.random.split(key, 5)

    # deterministic synthetic parameters (shapes implied by the ABN forward)
    x = jax.random.normal(kx, (B, C, H, W), jnp.float32)
    # conv3x3 weight, PyTorch layout [F, C, K, K] -> matmul layout [C*K*K, F]
    w1_t = jax.random.normal(k1, (F, C, K, K), jnp.float32) * 0.1
    w1 = w1_t.reshape(F, C * K * K).T                        # [CKK, F]
    b1 = jnp.zeros((1, F), jnp.float32)
    watt = jax.random.normal(k2, (1, F), jnp.float32) * 0.1  # 1x1 conv F->1
    batt = jnp.zeros((1, 1), jnp.float32)
    wfc = jax.random.normal(k3, (F, NUM_CLASSES), jnp.float32) * 0.1
    bfc = jax.random.normal(k4, (1, NUM_CLASSES), jnp.float32) * 0.01

    patches = im2col_nchw(x).reshape(B * HW, CKK)            # [B*HW, CKK] f32

    # bf16 matmul inputs (half the DMA bytes, 2x MXU rate); accumulate in f32.
    patches_bf = patches.astype(jnp.bfloat16)
    w1_bf = w1.astype(jnp.bfloat16)

    # lane-dense padded classifier params: zero weights / -1e30 bias in the
    # padded lanes (exp -> 0 under softmax); real classes sliced in the wrapper.
    wfc_pad = jnp.zeros((F, OUT_PAD), jnp.float32).at[:, :NUM_CLASSES].set(wfc)
    bfc_pad = jnp.full((1, OUT_PAD), -1e30, jnp.float32).at[:, :NUM_CLASSES].set(bfc)

    probs = activation_net_abn(patches_bf, w1_bf, b1, watt, batt, wfc_pad, bfc_pad)
    probs = jax.block_until_ready(probs)

    ref = reference_forward(patches_bf, w1_bf, b1, watt, batt, wfc, bfc)
    assert probs.shape == (B, NUM_CLASSES)
    # tolerance covers bf16 matmul inputs + EUP approximate reciprocals
    assert jnp.allclose(probs, ref, atol=2e-3, rtol=2e-3), (probs, ref)
    assert jnp.allclose(jnp.sum(probs, axis=-1), 1.0, atol=2e-3)

    print("KERNEL_OK")
</pallas_src>

<mosaic_0001>
module attributes {stable_mosaic.version = 11 : i64} {
  func.func @abn_kernel(%arg0: i32, %arg1: memref<512x36xbf16, #tpu.memory_space<vmem>>, %arg2: memref<36x32xbf16, #tpu.memory_space<vmem>>, %arg3: memref<1x32xf32, #tpu.memory_space<vmem>>, %arg4: memref<1x32xf32, #tpu.memory_space<vmem>>, %arg5: memref<1x1xf32, #tpu.memory_space<vmem>>, %arg6: memref<32x128xf32, #tpu.memory_space<vmem>>, %arg7: memref<1x128xf32, #tpu.memory_space<vmem>>, %arg8: memref<2x128xf32, #tpu.memory_space<vmem>>) attributes {dimension_semantics = [#tpu.dimension_semantics<arbitrary>], iteration_bounds = array<i64: 1>, scalar_prefetch = 0 : i64, scratch_operands = 0 : i64, tpu.core_type = #tpu.core_type<tc>, window_params = [{pipeline_mode = #tpu.pipeline_mode<synchronous>, transform_indices = @transform_0, window_bounds = array<i64: 512, 36>}, {pipeline_mode = #tpu.pipeline_mode<synchronous>, transform_indices = @transform_1, window_bounds = array<i64: 36, 32>}, {pipeline_mode = #tpu.pipeline_mode<synchronous>, transform_indices = @transform_2, window_bounds = array<i64: 1, 32>}, {pipeline_mode = #tpu.pipeline_mode<synchronous>, transform_indices = @transform_3, window_bounds = array<i64: 1, 32>}, {pipeline_mode = #tpu.pipeline_mode<synchronous>, transform_indices = @transform_4, window_bounds = array<i64: 1, 1>}, {pipeline_mode = #tpu.pipeline_mode<synchronous>, transform_indices = @transform_5, window_bounds = array<i64: 32, 128>}, {pipeline_mode = #tpu.pipeline_mode<synchronous>, transform_indices = @transform_6, window_bounds = array<i64: 1, 128>}, {pipeline_mode = #tpu.pipeline_mode<synchronous>, transform_indices = @transform_7, window_bounds = array<i64: 2, 128>}]} {
    %c0 = arith.constant 0 : index
    %c0_0 = arith.constant 0 : index
    %0 = vector.load %arg1[%c0, %c0_0] : memref<512x36xbf16, #tpu.memory_space<vmem>>, vector<512x36xbf16>
    %c0_1 = arith.constant 0 : index
    %c0_2 = arith.constant 0 : index
    %1 = vector.load %arg2[%c0_1, %c0_2] : memref<36x32xbf16, #tpu.memory_space<vmem>>, vector<36x32xbf16>
    %cst = arith.constant dense<0.000000e+00> : vector<512x32xf32>
    %2 = tpu.matmul %0, %1, %cst {dimension_numbers = #tpu.dot_dimension_numbers<[1], [0], [0], [1], [0, 0, 1, 1], [], []>} : vector<512x36xbf16>, vector<36x32xbf16>, vector<512x32xf32> -> vector<512x32xf32>
    %c0_3 = arith.constant 0 : index
    %c0_4 = arith.constant 0 : index
    %3 = vector.load %arg3[%c0_3, %c0_4] : memref<1x32xf32, #tpu.memory_space<vmem>>, vector<1x32xf32>
    %4 = vector.broadcast %3 : vector<1x32xf32> to vector<512x32xf32>
    %5 = arith.addf %2, %4 : vector<512x32xf32>
    %cst_5 = arith.constant 0.000000e+00 : f32
    %6 = vector.broadcast %cst_5 : f32 to vector<512x32xf32>
    %7 = arith.maximumf %5, %6 : vector<512x32xf32>
    %c0_6 = arith.constant 0 : index
    %c0_7 = arith.constant 0 : index
    %8 = vector.load %arg4[%c0_6, %c0_7] : memref<1x32xf32, #tpu.memory_space<vmem>>, vector<1x32xf32>
    %9 = vector.broadcast %8 : vector<1x32xf32> to vector<512x32xf32>
    %10 = arith.mulf %7, %9 : vector<512x32xf32>
    %cst_8 = arith.constant dense<0.000000e+00> : vector<512xf32>
    %11 = vector.multi_reduction <add>, %10, %cst_8 [1] : vector<512x32xf32> to vector<512xf32>
    %12 = vector.shape_cast %11 : vector<512xf32> to vector<512x1xf32>
    %c0_9 = arith.constant 0 : index
    %c0_10 = arith.constant 0 : index
    %13 = vector.load %arg5[%c0_9, %c0_10] : memref<1x1xf32, #tpu.memory_space<vmem>>, vector<1x1xf32>
    %14 = vector.broadcast %13 : vector<1x1xf32> to vector<512x1xf32>
    %15 = arith.addf %12, %14 : vector<512x1xf32>
    %16 = math.absf %15 : vector<512x1xf32>
    %cst_11 = arith.constant 0.000000e+00 : f32
    %17 = vector.broadcast %cst_11 : f32 to vector<512x1xf32>
    %18 = arith.subf %17, %16 : vector<512x1xf32>
    %19 = math.exp %18 : vector<512x1xf32>
    %cst_12 = arith.constant 1.000000e+00 : f32
    %20 = vector.broadcast %cst_12 : f32 to vector<512x1xf32>
    %21 = arith.addf %20, %19 : vector<512x1xf32>
    %22 = tpu.reciprocal %21 {approx = true} : vector<512x1xf32> -> vector<512x1xf32>
    %cst_13 = arith.constant 0.000000e+00 : f32
    %23 = vector.broadcast %cst_13 : f32 to vector<512x1xf32>
    %24 = arith.cmpf oge, %15, %23 : vector<512x1xf32>
    %25 = arith.mulf %19, %22 : vector<512x1xf32>
    %26 = arith.select %24, %22, %25 : vector<512x1xi1>, vector<512x1xf32>
    %cst_14 = arith.constant 1.000000e+00 : f32
    %27 = vector.broadcast %cst_14 : f32 to vector<512x1xf32>
    %28 = arith.addf %27, %26 : vector<512x1xf32>
    %29 = vector.broadcast %28 : vector<512x1xf32> to vector<512x32xf32>
    %30 = arith.mulf %7, %29 : vector<512x32xf32>
    %31 = vector.extract_strided_slice %30 {offsets = [0, 0], sizes = [256, 32], strides = [1, 1]} : vector<512x32xf32> to vector<256x32xf32>
    %cst_15 = arith.constant dense<0.000000e+00> : vector<32xf32>
    %32 = vector.multi_reduction <add>, %31, %cst_15 [0] : vector<256x32xf32> to vector<32xf32>
    %33 = vector.shape_cast %32 : vector<32xf32> to vector<1x32xf32>
    %cst_16 = arith.constant 2.560000e+02 : f32
    %34 = vector.broadcast %cst_16 : f32 to vector<1x32xf32>
    %35 = arith.divf %33, %34 : vector<1x32xf32>
    %36 = vector.extract_strided_slice %30 {offsets = [256, 0], sizes = [256, 32], strides = [1, 1]} : vector<512x32xf32> to vector<256x32xf32>
    %cst_17 = arith.constant dense<0.000000e+00> : vector<32xf32>
    %37 = vector.multi_reduction <add>, %36, %cst_17 [0] : vector<256x32xf32> to vector<32xf32>
    %38 = vector.shape_cast %37 : vector<32xf32> to vector<1x32xf32>
    %cst_18 = arith.constant 2.560000e+02 : f32
    %39 = vector.broadcast %cst_18 : f32 to vector<1x32xf32>
    %40 = arith.divf %38, %39 : vector<1x32xf32>
    %41 = tpu.concatenate %35, %40 in 0 : vector<1x32xf32>, vector<1x32xf32> -> vector<2x32xf32>
    %c0_19 = arith.constant 0 : index
    %c0_20 = arith.constant 0 : index
    %42 = vector.load %arg6[%c0_19, %c0_20] : memref<32x128xf32, #tpu.memory_space<vmem>>, vector<32x128xf32>
    %cst_21 = arith.constant dense<0.000000e+00> : vector<2x128xf32>
    %43 = tpu.matmul %41, %42, %cst_21 {dimension_numbers = #tpu.dot_dimension_numbers<[1], [0], [0], [1], [0, 0, 1, 1], [], []>} : vector<2x32xf32>, vector<32x128xf32>, vector<2x128xf32> -> vector<2x128xf32>
    %c0_22 = arith.constant 0 : index
    %c0_23 = arith.constant 0 : index
    %44 = vector.load %arg7[%c0_22, %c0_23] : memref<1x128xf32, #tpu.memory_space<vmem>>, vector<1x128xf32>
    %45 = vector.broadcast %44 : vector<1x128xf32> to vector<2x128xf32>
    %46 = arith.addf %43, %45 : vector<2x128xf32>
    %cst_24 = arith.constant dense<0xFF800000> : vector<2xf32>
    %47 = vector.multi_reduction <maximumf>, %46, %cst_24 [1] : vector<2x128xf32> to vector<2xf32>
    %48 = vector.shape_cast %47 : vector<2xf32> to vector<2x1xf32>
    %49 = vector.broadcast %48 : vector<2x1xf32> to vector<2x128xf32>
    %50 = arith.subf %46, %49 : vector<2x128xf32>
    %51 = math.exp %50 : vector<2x128xf32>
    %cst_25 = arith.constant dense<0.000000e+00> : vector<2xf32>
    %52 = vector.multi_reduction <add>, %51, %cst_25 [1] : vector<2x128xf32> to vector<2xf32>
    %53 = vector.shape_cast %52 : vector<2xf32> to vector<2x1xf32>
    %54 = tpu.reciprocal %53 {approx = true} : vector<2x1xf32> -> vector<2x1xf32>
    %55 = vector.broadcast %54 : vector<2x1xf32> to vector<2x128xf32>
    %56 = arith.mulf %51, %55 : vector<2x128xf32>
    %c0_26 = arith.constant 0 : index
    %c0_27 = arith.constant 0 : index
    %57 = vector.load %arg8[%c0_26, %c0_27] : memref<2x128xf32, #tpu.memory_space<vmem>>, vector<2x128xf32>
    tpu.vector_store %arg8[%c0_26, %c0_27], %56 {strides = array<i32>} : memref<2x128xf32, #tpu.memory_space<vmem>>, vector<2x128xf32>,
    return
  }
  func.func @transform_0(%arg0: i32) -> (i32, i32) {
    %c0_i32 = arith.constant 0 : i32
    %c0_i32_0 = arith.constant 0 : i32
    %c0_i32_1 = arith.constant 0 : i32
    return %c0_i32, %c0_i32_0 : i32, i32
  }
  func.func @transform_1(%arg0: i32) -> (i32, i32) {
    %c0_i32 = arith.constant 0 : i32
    %c0_i32_0 = arith.constant 0 : i32
    %c0_i32_1 = arith.constant 0 : i32
    return %c0_i32, %c0_i32_0 : i32, i32
  }
  func.func @transform_2(%arg0: i32) -> (i32, i32) {
    %c0_i32 = arith.constant 0 : i32
    %c0_i32_0 = arith.constant 0 : i32
    %c0_i32_1 = arith.constant 0 : i32
    return %c0_i32, %c0_i32_0 : i32, i32
  }
  func.func @transform_3(%arg0: i32) -> (i32, i32) {
    %c0_i32 = arith.constant 0 : i32
    %c0_i32_0 = arith.constant 0 : i32
    %c0_i32_1 = arith.constant 0 : i32
    return %c0_i32, %c0_i32_0 : i32, i32
  }
  func.func @transform_4(%arg0: i32) -> (i32, i32) {
    %c0_i32 = arith.constant 0 : i32
    %c0_i32_0 = arith.constant 0 : i32
    %c0_i32_1 = arith.constant 0 : i32
    return %c0_i32, %c0_i32_0 : i32, i32
  }
  func.func @transform_5(%arg0: i32) -> (i32, i32) {
    %c0_i32 = arith.constant 0 : i32
    %c0_i32_0 = arith.constant 0 : i32
    %c0_i32_1 = arith.constant 0 : i32
    return %c0_i32, %c0_i32_0 : i32, i32
  }
  func.func @transform_6(%arg0: i32) -> (i32, i32) {
    %c0_i32 = arith.constant 0 : i32
    %c0_i32_0 = arith.constant 0 : i32
    %c0_i32_1 = arith.constant 0 : i32
    return %c0_i32, %c0_i32_0 : i32, i32
  }
  func.func @transform_7(%arg0: i32) -> (i32, i32) {
    %c0_i32 = arith.constant 0 : i32
    %c0_i32_0 = arith.constant 0 : i32
    %c0_i32_1 = arith.constant 0 : i32
    return %c0_i32, %c0_i32_0 : i32, i32
  }
}

</mosaic_0001>

<bundles_post_ra>
// kernel: tpu_custom_call.1
= control target key start
LH: loop header
LB: loop body
LE: loop exit
PB: predicated region body
PF: predicated region fallthrough
CT: control target
= control target key end

     0   :  { %s4690_s0 = inlined_call_operand.vmem [shape: bf16[512,36], index: 0, kind: input, shape index: {}]   ;;  %s4691_s1 = inlined_call_operand.vmem [shape: bf16[36,32], index: 1, kind: input, shape index: {}]   ;;  %s4692_s2 = inlined_call_operand.vmem [shape: f32[1,32], index: 2, kind: input, shape index: {}]   ;;  %s4693_s3 = inlined_call_operand.vmem [shape: f32[1,32], index: 3, kind: input, shape index: {}]   ;;  %s4694_s4 = inlined_call_operand.<no memory space> [shape: f32[1,1], index: 4, kind: input, shape index: {}]   ;;  %s4695_s5 = inlined_call_operand.vmem [shape: f32[32,128], index: 5, kind: input, shape index: {}]   ;;  %s4696_s6 = inlined_call_operand.vmem [shape: f32[1,128], index: 6, kind: input, shape index: {}]   ;;  %s4697_s7 = inlined_call_operand.hbm [shape: f32[2,128], index: 7, kind: output, shape index: {}]  }
   0x1   :  { %v12_v0 = vstv %s4694_s4 }
   0x2   :  { %13 = vst [vmem:[#allocation2] sm:$0x1] %v12_v0 }
   0x3   :  { %v2561_v1 = vld [vmem:[%s4691_s1] sm:$0xff]   ;;  %v2562_v2 = vld [vmem:[%s4691_s1 + $0x8] sm:$0xff]   ;;  %vm281_vm0 = vcmask 293888   ;;  %v2563_v3 = vld [vmem:[%s4691_s1 + $0x10] ss:$0 sps:$4 sm:$0x33]  }
   0x4   :  { %2459 = vmatprep.subr.bf16.mxu0 %v2561_v1  ;;  %2546 = vmatprep.subr.bf16.mxu1 %v2561_v1  ;;  %v2564_v4 = vld [vmem:[%s4690_s0] sm:$0xff]   ;;  %v2565_v5 = vld [vmem:[%s4690_s0 + $0x90] sm:$0xff]   ;;  %vm378_vm1 = vcmask 1041408   ;;  %v2566_v7 = vld [vmem:[%s4690_s0 + $0x8] sm:$0xff]  }
   0x5   :  { %2460 = vmatpush3.bf16.msra.mxu0 %v2561_v1  ;;  %2549 = vmatpush3.bf16.msra.mxu1 %v2561_v1  ;;  %v380_v6 = vsel %vm378_vm1, %v2563_v3, 0  ;;  %v2567_v8 = vld [vmem:[%s4690_s0 + $0x98] sm:$0xff]   ;;  %v2568_v9 = vld [vmem:[%s4690_s0 + $0xa0] sm:$0xff]   ;;  %v2570_v10 = vld [vmem:[%s4690_s0 + $0x10] sm:$0xff]  }
   0x6   :  { %2461 = vmatprep.subr.bf16.mxu0 %v2562_v2  ;;  %2547 = vmatprep.subr.bf16.mxu1 %v2562_v2  ;;  %v2569_v11 = vld [vmem:[%s4690_s0 + $0xa8] sm:$0xff]   ;;  %v2571_v12 = vld [vmem:[%s4690_s0 + $0x18] sm:$0xff]   ;;  %v2572_v13 = vld [vmem:[%s4690_s0 + $0xb0] sm:$0xff]  }
   0x7   :  { %2465 = vmatprep.mubr.msk.bf16.mxu0 %vm281_vm0, %v2564_v4  ;;  %2501 = vmatprep.mubr.msk.bf16.mxu1 %vm281_vm0, %v2565_v5  ;;  %v2574_v14 = vld [vmem:[%s4690_s0 + $0x20] sm:$0xff]   ;;  %v2573_v15 = vld [vmem:[%s4690_s0 + $0xb8] sm:$0xff]   ;;  %v2575_v16 = vld [vmem:[%s4690_s0 + $0x28] sm:$0xff]  }
   0x8   :  { %v2576_v17 = vld [vmem:[%s4690_s0 + $0xc0] sm:$0xff]   ;;  %v2578_v18 = vld [vmem:[%s4690_s0 + $0x30] sm:$0xff]   ;;  %v2577_v19 = vld [vmem:[%s4690_s0 + $0xc8] sm:$0xff]  }
   0x9   :  { %2462 = vmatpush3.bf16.msra.mxu0 %v2562_v2  ;;  %2550 = vmatpush3.bf16.msra.mxu1 %v2562_v2  ;;  %v2579_v20 = vld [vmem:[%s4690_s0 + $0x38] sm:$0xff]  }
   0xa   :  { %2552 = vmatprep.subr.msk.bf16.mxu0 %vm378_vm1, %v2563_v3  ;;  %2553 = vmatprep.subr.msk.bf16.mxu1 %vm378_vm1, %v2563_v3 }
   0xd   :  { %2464 = vmatpush3.bf16.msra.mxu0 %v380_v6  ;;  %2551 = vmatpush3.bf16.msra.mxu1 %v380_v6 }
  0x10   :  { %2466 = vmatmul.mubr.msk.bf16.vlgmr.msra.gmra.mrb[0].mxu0 %vm281_vm0, %v2566_v7  ;;  %2502 = vmatmul.mubr.msk.bf16.vlgmr.msra.gmra.mrb[0].mxu1 %vm281_vm0, %v2567_v8 }
  0x11   :  { %2505 = vmatprep.mubr.msk.bf16.mxu1 %vm281_vm0, %v2568_v9  ;;  %2469 = vmatprep.mubr.msk.bf16.mxu0 %vm281_vm0, %v2570_v10 }
  0x18   :  { %2506 = vmatmul.mubr.msk.bf16.gmra.mrb[4].mxu1 %vm281_vm0, %v2569_v11  ;;  %2470 = vmatmul.mubr.msk.bf16.gmra.mrb[4].mxu0 %vm281_vm0, %v2571_v12 }
  0x19   :  { %2509 = vmatprep.mubr.msk.bf16.mxu1 %vm281_vm0, %v2572_v13  ;;  %2473 = vmatprep.mubr.msk.bf16.mxu0 %vm281_vm0, %v2574_v14 }
  0x20   :  { %2510 = vmatmul.mubr.msk.bf16.gmra.mrb[8].mxu1 %vm281_vm0, %v2573_v15  ;;  %2474 = vmatmul.mubr.msk.bf16.gmra.mrb[8].mxu0 %vm281_vm0, %v2575_v16 }
  0x21   :  { %2513 = vmatprep.mubr.msk.bf16.mxu1 %vm281_vm0, %v2576_v17  ;;  %2477 = vmatprep.mubr.msk.bf16.mxu0 %vm281_vm0, %v2578_v18 }
  0x22   :  { %14 = vsyncpa [#allocation4], 0  ;;  %v2580_v21 = vld [vmem:[%s4690_s0 + $0xd0] sm:$0xff]   ;;  %v2582_v22 = vld [vmem:[%s4690_s0 + $0x40] sm:$0xff]   ;;  %vm806_vm2 = vcmask 261120   ;;  %s2885_s8 = smov [#allocation3]  }
  0x23   :  { %v2581_v23 = vld [vmem:[%s4690_s0 + $0xd8] sm:$0xff]   ;;  %v2583_v24 = vld [vmem:[%s4690_s0 + $0x48] sm:$0xff]   ;;  %v2584_v25 = vld [vmem:[%s4690_s0 + $0xe0] sm:$0xff]   ;;  %s2339_s9 = sshll.u32 %s2885_s8, 4  ;;  %s2340_s9 = int_to_ptr.vmem [resolvable:$true] %s2339_s9 }
  0x24   :  { %v2586_v26 = vld [vmem:[%s4690_s0 + $0x50] sm:$0xff]   ;;  %v2585_v27 = vld [vmem:[%s4690_s0 + $0xe8] sm:$0xff]   ;;  %v2587_v28 = vld [vmem:[%s4690_s0 + $0x58] sm:$0xff]   ;;  %p2862_p1 = scmp.lt.s32.totalorder %s2340_s9, %s2340_s9 }
  0x25   :  { %v2588_v29 = vld [vmem:[%s4690_s0 + $0x60] sm:$0xff]   ;;  %v2589_v30 = vld [vmem:[%s4690_s0 + $0xf0] sm:$0xff]   ;;  %v2590_v31 = vld [vmem:[%s4690_s0 + $0x68] sm:$0xff]  }
  0x26   :  { %v2591_v32 = vld [vmem:[%s4690_s0 + $0xf8] sm:$0xff]   ;;  %v2592_v33 = vld [vmem:[%s4690_s0 + $0x70] sm:$0xff]   ;;  %v2594_v35 = vld [vmem:[%s4690_s0 + $0x80] sm:$0xff]  }
  0x27   :  { %v2593_v34 = vld [vmem:[%s4690_s0 + $0x78] sm:$0xff]   ;;  %v2595_v36 = vld [vmem:[%s4690_s0 + $0x88] sm:$0xff]   ;;  %v3072_v37 = vld [vmem:[%s4692_s2] ss:$0 sm:$0xff] }
  0x28   :  { %2514 = vmatmul.mubr.msk.bf16.gmra.mrb[12].mxu1 %vm281_vm0, %v2577_v19  ;;  %2478 = vmatmul.mubr.msk.bf16.gmra.mrb[12].mxu0 %vm281_vm0, %v2579_v20  ;;  %v3089_v47 = vld [vmem:[%s4693_s3] ss:$0 sm:$0xff] }
  0x29   :  { %2517 = vmatprep.mubr.msk.bf16.mxu1 %vm281_vm0, %v2580_v21  ;;  %2481 = vmatprep.mubr.msk.bf16.mxu0 %vm281_vm0, %v2582_v22 }
  0x30   :  { %2518 = vmatmul.mubr.msk.bf16.gmra.mrb[16].mxu1 %vm281_vm0, %v2581_v23  ;;  %2482 = vmatmul.mubr.msk.bf16.gmra.mrb[16].mxu0 %vm281_vm0, %v2583_v24 }
  0x31   :  { %2521 = vmatprep.mubr.msk.bf16.mxu1 %vm281_vm0, %v2584_v25  ;;  %2485 = vmatprep.mubr.msk.bf16.mxu0 %vm281_vm0, %v2586_v26 }
  0x38   :  { %2522 = vmatmul.mubr.msk.bf16.gmra.mrb[20].mxu1 %vm281_vm0, %v2585_v27  ;;  %2486 = vmatmul.mubr.msk.bf16.gmra.mrb[20].mxu0 %vm281_vm0, %v2587_v28 }
  0x39   :  { %2489 = vmatprep.mubr.msk.bf16.mxu0 %vm281_vm0, %v2588_v29  ;;  %2525 = vmatprep.mubr.msk.bf16.mxu1 %vm281_vm0, %v2589_v30 }
  0x40   :  { %2490 = vmatmul.mubr.msk.bf16.gmra.mrb[24].mxu0 %vm281_vm0, %v2590_v31  ;;  %2526 = vmatmul.mubr.msk.bf16.gmra.mrb[24].mxu1 %vm281_vm0, %v2591_v32 }
  0x41   :  { %2493 = vmatprep.mubr.msk.bf16.mxu0 %vm281_vm0, %v2592_v33 }
  0x48   :  { %2494 = vmatmul.mubr.msk.bf16.gmra.mrb[28].mxu0 %vm281_vm0, %v2593_v34 }
  0x49   :  { %2497 = vmatprep.mubr.msk.bf16.mxu0 %vm281_vm0, %v2594_v35 }
  0x50   :  { %2498 = vmatmul.mubr.msk.bf16.gmra.mrb[32].mxu0 %vm281_vm0, %v2595_v36 }
  0xe3   :  { %v2467_v38 = vpop.f32.mrb[0].mxu0  ;;  %v2503_v39 = vpop.f32.mrb[0].mxu1 }
  0xe4   :  { %v3075_v40 = vadd.f32 %v2467_v38, %v3072_v37  ;;  %v3078_v41 = vadd.f32 %v2503_v39, %v3072_v37  ;;  %v560_v42 = vpop.f32.mrb[1].mxu1  ;;  %v416_v43 = vpop.f32.mrb[1].mxu0 }
  0xe5   :  { %v3081_v44 = vadd.f32 %v3072_v37, %v560_v42  ;;  %v2504_v45 = vpop.f32.mrb[2].mxu1  ;;  %v3084_v46 = vadd.f32 %v3072_v37, %v416_v43  ;;  %v2468_v48 = vpop.f32.mrb[2].mxu0 }
  0xe6   :  { %4798 = vst [vmem:[#allocation6_spill] sm:$0xff] %v3078_v41  ;;  %v4719_v49 = vmax.f32 %v3075_v40, 0.0  ;;  %v4704_v50 = vmax.f32 %v3078_v41, 0.0  ;;  %v3094_v51 = vadd.f32 %v2504_v45, %v3072_v37  ;;  %v563_v52 = vpop.f32.mrb[3].mxu1  ;;  %v3097_v53 = vadd.f32 %v2468_v48, %v3072_v37  ;;  %v419_v54 = vpop.f32.mrb[3].mxu0 }
  0xe7   :  { %4799 = vst [vmem:[#allocation7_spill] sm:$0xff] %v3081_v44  ;;  %v4706_v55 = vmax.f32 %v3081_v44, 0.0  ;;  %v4721_v56 = vmax.f32 %v3084_v46, 0.0  ;;  %v3102_v57 = vadd.f32 %v3072_v37, %v419_v54  ;;  %v3112_v61 = vadd.f32 %v3072_v37, %v563_v52 }
  0xe8   :  { %4800 = vst [vmem:[#allocation8_spill] sm:$0xff] %v3094_v51  ;;  %v780_v58 = vmul.f32 %v3089_v47, %v4704_v50  ;;  %v744_v59 = vmul.f32 %v3089_v47, %v4719_v49  ;;  %v4715_v60 = vmax.f32 %v3097_v53, 0.0  ;;  %v4703_v63 = vmax.f32 %v3094_v51, 0.0 }
  0xe9   :  { %4801 = vst [vmem:[#allocation9_spill] sm:$0xff] %v3112_v61  ;;  %v742_v62 = vmul.f32 %v3089_v47, %v4721_v56  ;;  %v778_v2 = vmul.f32 %v3089_v47, %v4706_v55  ;;  %v4716_v3 = vmax.f32 %v3102_v57, 0.0  ;;  %v4705_v14 = vmax.f32 %v3112_v61, 0.0 }
  0xea   :  { %v921_v0 = vsel %vm806_vm2, %v780_v58, 0.0  ;;  %v813_v1 = vsel %vm806_vm2, %v744_v59, 0.0  ;;  %v745_v10 = vmul.f32 %v3089_v47, %v4715_v60  ;;  %v781_v17 = vmul.f32 %v3089_v47, %v4703_v63 }
  0xeb   :  { %922 = vadd.xlane.f32.xlu1 %v921_v0  ;;  %814 = vadd.xlane.f32.xlu0 %v813_v1  ;;  %v2507_v4 = vpop.f32.mrb[4].mxu1  ;;  %v2471_v5 = vpop.f32.mrb[4].mxu0  ;;  %v807_v6 = vsel %vm806_vm2, %v742_v62, 0.0  ;;  %v915_v15 = vsel %vm806_vm2, %v778_v2, 0.0  ;;  %v743_v19 = vmul.f32 %v3089_v47, %v4716_v3  ;;  %v779_v26 = vmul.f32 %v3089_v47, %v4705_v14 }
  0xec   :  { %v3126_v7 = vadd.f32 %v2507_v4, %v3072_v37  ;;  %v576_v8 = vpop.f32.mrb[5].mxu1  ;;  %v3129_v9 = vadd.f32 %v2471_v5, %v3072_v37  ;;  %v432_v11 = vpop.f32.mrb[5].mxu0  ;;  %v816_v22 = vsel %vm806_vm2, %v745_v10, 0.0  ;;  %v924_v25 = vsel %vm806_vm2, %v781_v17, 0.0 }
  0xed   :  { %v2508_v12 = vpop.f32.mrb[6].mxu1  ;;  %v2472_v13 = vpop.f32.mrb[6].mxu0  ;;  %v3146_v23 = vadd.f32 %v3072_v37, %v432_v11  ;;  %v3149_v24 = vadd.f32 %v3072_v37, %v576_v8  ;;  %v810_v27 = vsel %vm806_vm2, %v743_v19, 0.0  ;;  %v918_v43 = vsel %vm806_vm2, %v779_v26, 0.0 }
  0xee   :  { %4802 = vst [vmem:[#allocation10_spill] sm:$0xff] %v3126_v7  ;;  %v579_v16 = vpop.f32.mrb[7].mxu1  ;;  %v435_v18 = vpop.f32.mrb[7].mxu0  ;;  %v4699_v20 = vmax.f32 %v3126_v7, 0.0  ;;  %v4712_v21 = vmax.f32 %v3129_v9, 0.0  ;;  %v3161_v32 = vadd.f32 %v2472_v13, %v3072_v37  ;;  %v3168_v42 = vadd.f32 %v2508_v12, %v3072_v37 }
  0xef   :  { %916 = vadd.xlane.f32.xlu1 %v915_v15  ;;  %808 = vadd.xlane.f32.xlu0 %v807_v6  ;;  %4803 = vst [vmem:[#allocation11_spill] sm:$0xff] %v3149_v24  ;;  %v4714_v30 = vmax.f32 %v3146_v23, 0.0  ;;  %v4702_v39 = vmax.f32 %v3149_v24, 0.0  ;;  %v3174_v52 = vadd.f32 %v3072_v37, %v435_v18  ;;  %v3184_v1 = vadd.f32 %v3072_v37, %v579_v16 }
  0xf0   :  { %v784_v31 = vmul.f32 %v3089_v47, %v4699_v20  ;;  %v748_v33 = vmul.f32 %v3089_v47, %v4712_v21  ;;  %4804 = vst [vmem:[#allocation12_spill] sm:$0xff] %v3168_v42  ;;  %v4710_v58 = vmax.f32 %v3161_v32, 0.0  ;;  %v4698_v0 = vmax.f32 %v3168_v42, 0.0 }
  0xf1   :  { %v746_v62 = vmul.f32 %v3089_v47, %v4714_v30  ;;  %4805 = vst [vmem:[#allocation13_spill] sm:$0xff] %v3184_v1  ;;  %v782_v2 = vmul.f32 %v3089_v47, %v4702_v39  ;;  %v4711_v4 = vmax.f32 %v3174_v52, 0.0  ;;  %v4701_v18 = vmax.f32 %v3184_v1, 0.0 }
  0xf2   :  { %v933_v54 = vsel %vm806_vm2, %v784_v31, 0.0  ;;  %v825_v59 = vsel %vm806_vm2, %v748_v33, 0.0  ;;  %v749_v12 = vmul.f32 %v3089_v47, %v4710_v58 }
  0xf3   :  { %925 = vadd.xlane.f32.xlu1 %v924_v25  ;;  %817 = vadd.xlane.f32.xlu0 %v816_v22  ;;  %v2511_v28 = vpop.f32.mrb[8].mxu1  ;;  %v2475_v29 = vpop.f32.mrb[8].mxu0  ;;  %v819_v8 = vsel %vm806_vm2, %v746_v62, 0.0  ;;  %v927_v19 = vsel %vm806_vm2, %v782_v2, 0.0  ;;  %v785_v22 = vmul.f32 %v3089_v47, %v4698_v0 }
  0xf4   :  { %v592_v34 = vpop.f32.mrb[9].mxu1  ;;  %v448_v35 = vpop.f32.mrb[9].mxu0  ;;  %v3192_v10 = vadd.f32 %v2511_v28, %v3072_v37  ;;  %v3195_v11 = vadd.f32 %v2475_v29, %v3072_v37  ;;  %v828_v31 = vsel %vm806_vm2, %v749_v12, 0.0 }
  0xf5   :  { %v2512_v36 = vpop.f32.mrb[10].mxu1  ;;  %v2476_v38 = vpop.f32.mrb[10].mxu0  ;;  %v3224_v33 = vadd.f32 %v3072_v37, %v448_v35 }
  0xf6   :  { %v3171_v45 = vpop.f32.mrb[11].mxu1  ;;  %v451_v48 = vpop.f32.mrb[11].mxu0  ;;  %4806 = vst [vmem:[#allocation14_spill] sm:$0xff] %v3192_v10  ;;  %4807 = vst [vmem:[#allocation15_spill] sm:$0xff] %v3195_v11  ;;  %v4700_v28 = vmax.f32 %v3192_v10, 0.0  ;;  %v4707_v29 = vmax.f32 %v3195_v11, 0.0  ;;  %v3243_v12 = vadd.f32 %v2476_v38, %v3072_v37  ;;  %v3258_v20 = vadd.f32 %v2512_v36, %v3072_v37 }
  0xf7   :  { %919 = vadd.xlane.f32.xlu1 %v918_v43  ;;  %811 = vadd.xlane.f32.xlu0 %v810_v27  ;;  %v747_v27 = vmul.f32 %v3089_v47, %v4711_v4  ;;  %v3227_v43 = vadd.f32 %v3072_v37, %v592_v34  ;;  %v4709_v35 = vmax.f32 %v3224_v33, 0.0  ;;  %v3266_v39 = vadd.f32 %v3072_v37, %v451_v48 }
  0xf8   :  { %v788_v34 = vmul.f32 %v3089_v47, %v4700_v28  ;;  %4809 = vst [vmem:[#allocation17_spill] sm:$0xff] %v3243_v12  ;;  %4810 = vst [vmem:[#allocation18_spill] sm:$0xff] %v3258_v20  ;;  %v4713_v50 = vmax.f32 %v3243_v12, 0.0  ;;  %v3277_v55 = vadd.f32 %v3072_v37, %v3171_v45 }
  0xf9   :  { %4808 = vst [vmem:[#allocation16_spill] sm:$0xff] %v3227_v43  ;;  %v822_v62 = vsel %vm806_vm2, %v747_v27, 0.0  ;;  %v4708_v0 = vmax.f32 %v3227_v43, 0.0  ;;  %4811 = vst [vmem:[#allocation19_spill] sm:$0xff] %v3266_v39  ;;  %v750_v36 = vmul.f32 %v3089_v47, %v4709_v35 }
  0xfa   :  { %v945_v63 = vsel %vm806_vm2, %v788_v34, 0.0  ;;  %4812 = vst [vmem:[#allocation20_spill] sm:$0xff] %v3277_v55 }
  0xfb   :  { %934 = vadd.xlane.f32.xlu1 %v933_v54  ;;  %826 = vadd.xlane.f32.xlu0 %v825_v59  ;;  %v2515_v5 = vpop.f32.mrb[12].mxu1  ;;  %v2479_v6 = vpop.f32.mrb[12].mxu0  ;;  %v936_v54 = vsel %vm806_vm2, %v785_v22, 0.0  ;;  %v783_v59 = vmul.f32 %v3089_v47, %v4701_v18  ;;  %v786_v48 = vmul.f32 %v3089_v47, %v4708_v0  ;;  %v753_v0 = vmul.f32 %v3089_v47, %v4713_v50 }
  0xfc   :  { %v3200_v13 = vpop.f32.mrb[13].mxu1  ;;  %v3202_v15 = vpop.f32.mrb[13].mxu0  ;;  %v3292_v45 = vadd.f32 %v2479_v6, %v3072_v37 }
  0xfd   :  { %v3204_v16 = vpop.f32.mrb[14].mxu1  ;;  %v3206_v17 = vpop.f32.mrb[14].mxu0  ;;  %v930_v38 = vsel %vm806_vm2, %v783_v59, 0.0  ;;  %v4717_v59 = vmax.f32 %v3258_v20, 0.0  ;;  %v3322_v3 = vadd.f32 %v3072_v37, %v3202_v15 }
  0xfe   :  { %v3213_v25 = vpop.f32.mrb[15].mxu1  ;;  %v3215_v26 = vpop.f32.mrb[15].mxu0  ;;  %4814 = vst [vmem:[#allocation22_spill] sm:$0xff] %v3292_v45  ;;  %v4725_v60 = vmax.f32 %v3292_v45, 0.0 }
  0xff   :  { %928 = vadd.xlane.f32.xlu1 %v927_v19  ;;  %820 = vadd.xlane.f32.xlu0 %v819_v8  ;;  %v752_v19 = vmul.f32 %v3089_v47, %v4707_v29  ;;  %v3289_v29 = vadd.f32 %v2515_v5, %v3072_v37  ;;  %v939_v5 = vsel %vm806_vm2, %v786_v48, 0.0  ;;  %v789_v6 = vmul.f32 %v3089_v47, %v4717_v59 }
 0x100   :  { %v840_v48 = vsel %vm806_vm2, %v753_v0, 0.0  ;;  %4815 = vst [vmem:[#allocation23_spill] sm:$0xff] %v3322_v3  ;;  %v3326_v59 = vadd.f32 %v3072_v37, %v3200_v13 }
 0x101   :  { %v837_v14 = vsel %vm806_vm2, %v752_v19, 0.0  ;;  %4813 = vst [vmem:[#allocation21_spill] sm:$0xff] %v3289_v29  ;;  %v4722_v30 = vmax.f32 %v3289_v29, 0.0 }
 0x102   :  { %4816 = vst [vmem:[#allocation24_spill] sm:$0xff] %v3326_v59 }
 0x103   :  { %937 = vadd.xlane.f32.xlu1 %v936_v54  ;;  %829 = vadd.xlane.f32.xlu0 %v828_v31  ;;  %v3234_v2 = vpop.f32.mrb[16].mxu1  ;;  %v3236_v8 = vpop.f32.mrb[16].mxu0  ;;  %v792_v13 = vmul.f32 %v3089_v47, %v4722_v30  ;;  %v3359_v30 = vadd.f32 %v3204_v16, %v3072_v37  ;;  %v4820_v16 = vmax.f32 %v3322_v3, 0.0 }
 0x104   :  { %v3248_v22 = vpop.f32.mrb[17].mxu1  ;;  %v3250_v27 = vpop.f32.mrb[17].mxu0 }
 0x105   :  { %v3252_v31 = vpop.f32.mrb[18].mxu1  ;;  %v3254_v54 = vpop.f32.mrb[18].mxu0  ;;  %4818 = vst [vmem:[#allocation26_spill] sm:$0xff] %v3359_v30  ;;  %v957_v10 = vsel %vm806_vm2, %v792_v13, 0.0 }
 0x106   :  { %v3261_v28 = vpop.f32.mrb[19].mxu1  ;;  %v3263_v18 = vpop.f32.mrb[19].mxu0 }
 0x107   :  { %931 = vadd.xlane.f32.xlu1 %v930_v38  ;;  %823 = vadd.xlane.f32.xlu0 %v822_v62  ;;  %v4718_v62 = vmax.f32 %v3266_v39, 0.0  ;;  %v831_v38 = vsel %vm806_vm2, %v750_v36, 0.0  ;;  %v4720_v36 = vmax.f32 %v3277_v55, 0.0 }
 0x109   :  { %v751_v50 = vmul.f32 %v3089_v47, %v4718_v62 }
 0x10b   :  { %946 = vadd.xlane.f32.xlu1 %v945_v63  ;;  %838 = vadd.xlane.f32.xlu0 %v837_v14  ;;  %v3283_v34 = vpop.f32.mrb[20].mxu1  ;;  %v3285_v19 = vpop.f32.mrb[20].mxu0  ;;  %v834_v62 = vsel %vm806_vm2, %v751_v50, 0.0 }
 0x10c   :  { %v3297_v63 = vpop.f32.mrb[21].mxu1  ;;  %v3299_v14 = vpop.f32.mrb[21].mxu0 }
 0x10d   :  { %v3301_v35 = vpop.f32.mrb[22].mxu1  ;;  %v3303_v58 = vpop.f32.mrb[22].mxu0 }
 0x10e   :  { %v3310_v4 = vpop.f32.mrb[23].mxu1  ;;  %v3312_v21 = vpop.f32.mrb[23].mxu0 }
 0x10f   :  { %940 = vadd.xlane.f32.xlu1 %v939_v5  ;;  %832 = vadd.xlane.f32.xlu0 %v831_v38  ;;  %v948_v38 = vsel %vm806_vm2, %v789_v6, 0.0  ;;  %v787_v5 = vmul.f32 %v3089_v47, %v4720_v36  ;;  %v3343_v6 = vadd.f32 %v3206_v17, %v3072_v37 }
 0x111   :  { %4817 = vst [vmem:[#allocation25_spill] sm:$0xff] %v3343_v6  ;;  %v942_v17 = vsel %vm806_vm2, %v787_v5, 0.0  ;;  %v754_v5 = vmul.f32 %v3089_v47, %v4820_v16  ;;  %v3390_v16 = vadd.f32 %v3234_v2, %v3072_v37  ;;  %v4825_v45 = vmax.f32 %v3343_v6, 0.0 }
 0x113   :  { %949 = vadd.xlane.f32.xlu1 %v948_v38  ;;  %841 = vadd.xlane.f32.xlu0 %v840_v48  ;;  %v3333_v49 = vpop.f32.mrb[24].mxu0  ;;  %v3335_v0 = vpop.f32.mrb[24].mxu1  ;;  %v756_v48 = vmul.f32 %v3089_v47, %v4725_v60  ;;  %v3368_v60 = vadd.f32 %v3072_v37, %v3215_v26  ;;  %4823 = vst [vmem:[#allocation29_spill] sm:$0xff] %v3390_v16  ;;  %v4734_v6 = vmax.f32 %v3390_v16, 0.0 }
 0x114   :  { %v3348_v38 = vpop.f32.mrb[25].mxu0  ;;  %v3350_v50 = vpop.f32.mrb[25].mxu1 }
 0x115   :  { %v3352_v36 = vpop.f32.mrb[26].mxu0  ;;  %v3354_v56 = vpop.f32.mrb[26].mxu1  ;;  %4819 = vst [vmem:[#allocation27_spill] sm:$0xff] %v3368_v60  ;;  %v849_v55 = vsel %vm806_vm2, %v756_v48, 0.0  ;;  %v843_v48 = vsel %vm806_vm2, %v754_v5, 0.0 }
 0x116   :  { %v3362_v29 = vpop.f32.mrb[27].mxu1  ;;  %v3364_v20 = vpop.f32.mrb[27].mxu0 }
 0x117   :  { %943 = vadd.xlane.f32.xlu1 %v942_v17  ;;  %835 = vadd.xlane.f32.xlu0 %v834_v62  ;;  %v3379_v17 = vadd.f32 %v3072_v37, %v3213_v25  ;;  %v4822_v62 = vmax.f32 %v3326_v59, 0.0  ;;  %v3394_v25 = vadd.f32 %v3236_v8, %v3072_v37  ;;  %v4826_v59 = vmax.f32 %v3359_v30, 0.0 }
 0x118   :  { %v4827_v8 = vmax.f32 %v3368_v60, 0.0  ;;  %v2881_v30 = vmov 0  }
 0x119   :  { %4821 = vst [vmem:[#allocation28_spill] sm:$0xff] %v3379_v17  ;;  %v790_v26 = vmul.f32 %v3089_v47, %v4822_v62  ;;  %4824 = vst [vmem:[#allocation30_spill] sm:$0xff] %v3394_v25  ;;  %v757_v62 = vmul.f32 %v3089_v47, %v4825_v45  ;;  %v793_v2 = vmul.f32 %v3089_v47, %v4826_v59  ;;  %2560 = vset.pattern.permute.xlu0 %v2881_v30 }
 0x11a   :  { %v755_v45 = vmul.f32 %v3089_v47, %v4827_v8  ;;  %2559 = vset.pattern.permute.xlu1 %v2881_v30  ;;  %v3422_v59 = vadd.f32 %v3072_v37, %v3248_v22  ;;  %v796_v30 = vmul.f32 %v3089_v47, %v4734_v6  ;;  %v3437_v22 = vadd.f32 %v3254_v54, %v3072_v37 }
 0x11b   :  { %958 = vadd.xlane.f32.xlu1 %v957_v10  ;;  %850 = vadd.xlane.f32.xlu0 %v849_v55  ;;  %v3385_v15 = vpop.f32.mrb[28].mxu0  ;;  %v951_v5 = vsel %vm806_vm2, %v790_v26, 0.0  ;;  %v852_v13 = vsel %vm806_vm2, %v757_v62, 0.0  ;;  %v3418_v26 = vadd.f32 %v3072_v37, %v3250_v27  ;;  %v3449_v27 = vadd.f32 %v3252_v31, %v3072_v37 }
 0x11c   :  { %v3399_v10 = vpop.f32.mrb[29].mxu0  ;;  %4829 = vst [vmem:[#allocation32_spill] sm:$0xff] %v3422_v59  ;;  %v846_v62 = vsel %vm806_vm2, %v755_v45, 0.0  ;;  %4831 = vst [vmem:[#allocation33_spill] sm:$0xff] %v3437_v22  ;;  %v3456_v54 = vadd.f32 %v3072_v37, %v3263_v18 }
 0x11d   :  { %v3401_v55 = vpop.f32.mrb[30].mxu0  ;;  %4828 = vst [vmem:[#allocation31_spill] sm:$0xff] %v3418_v26  ;;  %4833 = vst [vmem:[#allocation34_spill] sm:$0xff] %v3449_v27 }
 0x11e   :  { %v3408_v43 = vpop.f32.mrb[31].mxu0  ;;  %4834 = vst [vmem:[#allocation35_spill] sm:$0xff] %v3456_v54 }
 0x11f   :  { %952 = vadd.xlane.f32.xlu1 %v951_v5  ;;  %844 = vadd.xlane.f32.xlu0 %v843_v48  ;;  %v960_v48 = vsel %vm806_vm2, %v793_v2, 0.0  ;;  %v4830_v5 = vmax.f32 %v3379_v17, 0.0  ;;  %v4832_v2 = vmax.f32 %v3394_v25, 0.0  ;;  %v4835_v17 = vmax.f32 %v3418_v26, 0.0 }
 0x120   :  { %v3476_v25 = vadd.f32 %v3283_v34, %v3072_v37 }
 0x121   :  { %v791_v8 = vmul.f32 %v3089_v47, %v4830_v5  ;;  %v760_v5 = vmul.f32 %v3089_v47, %v4832_v2  ;;  %v969_v2 = vsel %vm806_vm2, %v796_v30, 0.0  ;;  %v758_v31 = vmul.f32 %v3089_v47, %v4835_v17 }
 0x122   :  { %v4739_v30 = vmax.f32 %v3456_v54, 0.0  ;;  %4838 = vst [vmem:[#allocation37_spill] sm:$0xff] %v3476_v25  ;;  %v3480_v17 = vadd.f32 %v3285_v19, %v3072_v37  ;;  %v4740_v19 = vmax.f32 %v3476_v25, 0.0 }
 0x123   :  { %961 = vadd.xlane.f32.xlu1 %v960_v48  ;;  %853 = vadd.xlane.f32.xlu0 %v852_v13  ;;  %v3429_v42 = vpop.f32.mrb[32].mxu0  ;;  %v954_v6 = vsel %vm806_vm2, %v791_v8, 0.0  ;;  %v861_v45 = vsel %vm806_vm2, %v760_v5, 0.0  ;;  %v855_v5 = vsel %vm806_vm2, %v758_v31, 0.0 }
 0x124   :  { %v3442_v48 = vpop.f32.mrb[33].mxu0  ;;  %4839 = vst [vmem:[#allocation38_spill] sm:$0xff] %v3480_v17  ;;  %v759_v34 = vmul.f32 %v3089_v47, %v4739_v30 }
 0x125   :  { %v3444_v13 = vpop.f32.mrb[34].mxu0 }
 0x126   :  { %v3452_v16 = vpop.f32.mrb[35].mxu0  ;;  %v858_v30 = vsel %vm806_vm2, %v759_v34, 0.0 }
 0x127   :  { %955 = vadd.xlane.f32.xlu1 %v954_v6  ;;  %847 = vadd.xlane.f32.xlu0 %v846_v62  ;;  %v3467_v6 = vadd.f32 %v3072_v37, %v3261_v28  ;;  %v4837_v62 = vmax.f32 %v3422_v59, 0.0  ;;  %v4840_v28 = vmax.f32 %v3437_v22, 0.0  ;;  %v4741_v59 = vmax.f32 %v3480_v17, 0.0 }
 0x129   :  { %4836 = vst [vmem:[#allocation36_spill] sm:$0xff] %v3467_v6  ;;  %v794_v18 = vmul.f32 %v3089_v47, %v4837_v62  ;;  %v761_v8 = vmul.f32 %v3089_v47, %v4840_v28  ;;  %v3498_v62 = vadd.f32 %v3072_v37, %v3299_v14  ;;  %v3512_v14 = vadd.f32 %v3303_v58, %v3072_v37 }
 0x12b   :  { %970 = vadd.xlane.f32.xlu1 %v969_v2  ;;  %862 = vadd.xlane.f32.xlu0 %v861_v45  ;;  %v963_v45 = vsel %vm806_vm2, %v794_v18, 0.0  ;;  %v4841_v2 = vmax.f32 %v3449_v27, 0.0  ;;  %v864_v28 = vsel %vm806_vm2, %v761_v8, 0.0  ;;  %4842 = vst [vmem:[#allocation39_spill] sm:$0xff] %v3498_v62  ;;  %v3502_v18 = vadd.f32 %v3072_v37, %v3297_v63  ;;  %4845 = vst [vmem:[#allocation41_spill] sm:$0xff] %v3512_v14 }
 0x12c   :  { %v4742_v8 = vmax.f32 %v3498_v62, 0.0  ;;  %v800_v63 = vmul.f32 %v3089_v47, %v4740_v19  ;;  %v4743_v58 = vmax.f32 %v3512_v14, 0.0 }
 0x12d   :  { %v797_v31 = vmul.f32 %v3089_v47, %v4841_v2  ;;  %4843 = vst [vmem:[#allocation40_spill] sm:$0xff] %v3502_v18 }
 0x12f   :  { %964 = vadd.xlane.f32.xlu1 %v963_v45  ;;  %856 = vadd.xlane.f32.xlu0 %v855_v5  ;;  %v972_v5 = vsel %vm806_vm2, %v797_v31, 0.0  ;;  %v4844_v45 = vmax.f32 %v3467_v6, 0.0  ;;  %v764_v31 = vmul.f32 %v3089_v47, %v4741_v59  ;;  %v762_v59 = vmul.f32 %v3089_v47, %v4742_v8 }
 0x131   :  { %v795_v2 = vmul.f32 %v3089_v47, %v4844_v45  ;;  %v873_v19 = vsel %vm806_vm2, %v764_v31, 0.0  ;;  %v3534_v45 = vadd.f32 %v3072_v37, %v3310_v4  ;;  %v867_v31 = vsel %vm806_vm2, %v762_v59, 0.0 }
 0x132   :  { %v3551_v4 = vadd.f32 %v3335_v0, %v3072_v37 }
 0x133   :  { %973 = vadd.xlane.f32.xlu1 %v972_v5  ;;  %865 = vadd.xlane.f32.xlu0 %v864_v28  ;;  %v3523_v28 = vadd.f32 %v3301_v35, %v3072_v37  ;;  %v966_v34 = vsel %vm806_vm2, %v795_v2, 0.0  ;;  %v981_v5 = vsel %vm806_vm2, %v800_v63, 0.0  ;;  %4847 = vst [vmem:[#allocation43_spill] sm:$0xff] %v3534_v45  ;;  %v3539_v2 = vadd.f32 %v3072_v37, %v3312_v21 }
 0x134   :  { %4851 = vst [vmem:[#allocation46_spill] sm:$0xff] %v3551_v4  ;;  %v765_v21 = vmul.f32 %v3089_v47, %v4743_v58  ;;  %v4745_v8 = vmax.f32 %v3534_v45, 0.0  ;;  %v4746_v0 = vmax.f32 %v3551_v4, 0.0 }
 0x135   :  { %4846 = vst [vmem:[#allocation42_spill] sm:$0xff] %v3523_v28  ;;  %v4744_v35 = vmax.f32 %v3523_v28, 0.0  ;;  %4848 = vst [vmem:[#allocation44_spill] sm:$0xff] %v3539_v2 }
 0x136   :  { %v799_v58 = vmul.f32 %v3089_v47, %v4745_v8  ;;  %v3607_v8 = vadd.f32 %v3072_v37, %v3364_v20  ;;  %v3637_v20 = vadd.f32 %v3072_v37, %v3399_v10 }
 0x137   :  { %967 = vadd.xlane.f32.xlu1 %v966_v34  ;;  %859 = vadd.xlane.f32.xlu0 %v858_v30  ;;  %v4849_v30 = vmax.f32 %v3502_v18, 0.0  ;;  %v3547_v34 = vadd.f32 %v3333_v49, %v3072_v37  ;;  %v801_v59 = vmul.f32 %v3089_v47, %v4744_v35 }
 0x138   :  { %4858 = vst [vmem:[#allocation52_spill] sm:$0xff] %v3607_v8  ;;  %4862 = vst [vmem:[#allocation55_spill] sm:$0xff] %v3637_v20 }
 0x139   :  { %v798_v63 = vmul.f32 %v3089_v47, %v4849_v30  ;;  %4850 = vst [vmem:[#allocation45_spill] sm:$0xff] %v3547_v34  ;;  %v4747_v49 = vmax.f32 %v3547_v34, 0.0  ;;  %v3570_v30 = vadd.f32 %v3072_v37, %v3348_v38 }
 0x13b   :  { %982 = vadd.xlane.f32.xlu1 %v981_v5  ;;  %874 = vadd.xlane.f32.xlu0 %v873_v19  ;;  %v975_v19 = vsel %vm806_vm2, %v798_v63, 0.0  ;;  %v876_v5 = vsel %vm806_vm2, %v765_v21, 0.0  ;;  %4852 = vst [vmem:[#allocation47_spill] sm:$0xff] %v3570_v30  ;;  %v3574_v63 = vadd.f32 %v3072_v37, %v3350_v50  ;;  %v804_v21 = vmul.f32 %v3089_v47, %v4746_v0 }
 0x13c   :  { %v768_v38 = vmul.f32 %v3089_v47, %v4747_v49  ;;  %v3588_v50 = vadd.f32 %v3354_v56, %v3072_v37 }
 0x13d   :  { %4853 = vst [vmem:[#allocation48_spill] sm:$0xff] %v3574_v63  ;;  %v993_v0 = vsel %vm806_vm2, %v804_v21, 0.0  ;;  %v4859_v21 = vmax.f32 %v3570_v30, 0.0 }
 0x13e   :  { %4855 = vst [vmem:[#allocation49_spill] sm:$0xff] %v3588_v50  ;;  %v885_v49 = vsel %vm806_vm2, %v768_v38, 0.0  ;;  %v4749_v56 = vmax.f32 %v3588_v50, 0.0 }
 0x13f   :  { %976 = vadd.xlane.f32.xlu1 %v975_v19  ;;  %868 = vadd.xlane.f32.xlu0 %v867_v31  ;;  %v984_v31 = vsel %vm806_vm2, %v801_v59, 0.0  ;;  %v4854_v19 = vmax.f32 %v3539_v2, 0.0  ;;  %v978_v59 = vsel %vm806_vm2, %v799_v58, 0.0  ;;  %v3603_v58 = vadd.f32 %v3072_v37, %v3362_v29 }
 0x140   :  { %v766_v38 = vmul.f32 %v3089_v47, %v4859_v21  ;;  %v3618_v29 = vadd.f32 %v3429_v42, %v3072_v37 }
 0x141   :  { %v763_v35 = vmul.f32 %v3089_v47, %v4854_v19  ;;  %v4748_v19 = vmax.f32 %v3574_v63, 0.0  ;;  %4857 = vst [vmem:[#allocation51_spill] sm:$0xff] %v3603_v58 }
 0x142   :  { %4860 = vst [vmem:[#allocation53_spill] sm:$0xff] %v3618_v29 }
 0x143   :  { %985 = vadd.xlane.f32.xlu1 %v984_v31  ;;  %877 = vadd.xlane.f32.xlu0 %v876_v5  ;;  %v3595_v5 = vadd.f32 %v3352_v36, %v3072_v37  ;;  %v870_v31 = vsel %vm806_vm2, %v763_v35, 0.0  ;;  %v802_v35 = vmul.f32 %v3089_v47, %v4748_v19  ;;  %v3627_v19 = vadd.f32 %v3385_v15, %v3072_v37 }
 0x145   :  { %4856 = vst [vmem:[#allocation50_spill] sm:$0xff] %v3595_v5  ;;  %v4750_v36 = vmax.f32 %v3595_v5, 0.0  ;;  %4861 = vst [vmem:[#allocation54_spill] sm:$0xff] %v3627_v19  ;;  %v987_v21 = vsel %vm806_vm2, %v802_v35, 0.0  ;;  %v4863_v35 = vmax.f32 %v3607_v8, 0.0 }
 0x147   :  { %979 = vadd.xlane.f32.xlu1 %v978_v59  ;;  %871 = vadd.xlane.f32.xlu0 %v870_v31  ;;  %v4751_v59 = vmax.f32 %v3603_v58, 0.0  ;;  %v805_v31 = vmul.f32 %v3089_v47, %v4749_v56  ;;  %v769_v42 = vmul.f32 %v3089_v47, %v4750_v36 }
 0x149   :  { %v803_v15 = vmul.f32 %v3089_v47, %v4751_v59  ;;  %v888_v36 = vsel %vm806_vm2, %v769_v42, 0.0  ;;  %v4753_v59 = vmax.f32 %v3637_v20, 0.0  ;;  %v4867_v42 = vmax.f32 %v3627_v19, 0.0 }
 0x14b   :  { %994 = vadd.xlane.f32.xlu1 %v993_v0  ;;  %886 = vadd.xlane.f32.xlu0 %v885_v49  ;;  %v879_v49 = vsel %vm806_vm2, %v766_v38, 0.0  ;;  %v4752_v0 = vmax.f32 %v3618_v29, 0.0  ;;  %v767_v38 = vmul.f32 %v3089_v47, %v4863_v35  ;;  %v3658_v35 = vadd.f32 %v3401_v55, %v3072_v37 }
 0x14c   :  { %v990_v56 = vsel %vm806_vm2, %v803_v15, 0.0  ;;  %v3674_v15 = vadd.f32 %v3072_v37, %v3408_v43 }
 0x14d   :  { %v776_v10 = vmul.f32 %v3089_v47, %v4752_v0  ;;  %4865 = vst [vmem:[#allocation57_spill] sm:$0xff] %v3658_v35  ;;  %v4754_v55 = vmax.f32 %v3658_v35, 0.0 }
 0x14e   :  { %4868 = vst [vmem:[#allocation59_spill] sm:$0xff] %v3674_v15  ;;  %v4755_v43 = vmax.f32 %v3674_v15, 0.0 }
 0x14f   :  { %988 = vadd.xlane.f32.xlu1 %v987_v21  ;;  %880 = vadd.xlane.f32.xlu0 %v879_v49  ;;  %v3648_v21 = vadd.f32 %v3072_v37, %v3442_v48  ;;  %v996_v49 = vsel %vm806_vm2, %v805_v31, 0.0  ;;  %v3664_v31 = vadd.f32 %v3444_v13, %v3072_v37  ;;  %v909_v0 = vsel %vm806_vm2, %v776_v10, 0.0 }
 0x150   :  { %v770_v13 = vmul.f32 %v3089_v47, %v4753_v59  ;;  %v3682_v48 = vadd.f32 %v3072_v37, %v3452_v16 }
 0x151   :  { %4864 = vst [vmem:[#allocation56_spill] sm:$0xff] %v3648_v21  ;;  %4866 = vst [vmem:[#allocation58_spill] sm:$0xff] %v3664_v31  ;;  %v4870_v10 = vmax.f32 %v3648_v21, 0.0  ;;  %v4871_v16 = vmax.f32 %v3664_v31, 0.0 }
 0x152   :  { %4869 = vst [vmem:[#allocation60_spill] sm:$0xff] %v3682_v48  ;;  %v4756_v59 = vmax.f32 %v3682_v48, 0.0  ;;  %v891_v37 = vsel %vm806_vm2, %v770_v13, 0.0 }
 0x153   :  { %997 = vadd.xlane.f32.xlu1 %v996_v49  ;;  %889 = vadd.xlane.f32.xlu0 %v888_v36  ;;  %v882_v36 = vsel %vm806_vm2, %v767_v38, 0.0  ;;  %v772_v49 = vmul.f32 %v3089_v47, %v4867_v42  ;;  %v773_v42 = vmul.f32 %v3089_v47, %v4754_v55 }
 0x157   :  { %991 = vadd.xlane.f32.xlu1 %v990_v56  ;;  %883 = vadd.xlane.f32.xlu0 %v882_v36  ;;  %v897_v56 = vsel %vm806_vm2, %v772_v49, 0.0  ;;  %v774_v36 = vmul.f32 %v3089_v47, %v4870_v10  ;;  %v777_v49 = vmul.f32 %v3089_v47, %v4871_v16  ;;  %v775_v10 = vmul.f32 %v3089_v47, %v4756_v59 }
 0x159   :  { %v903_v38 = vsel %vm806_vm2, %v774_v36, 0.0  ;;  %v771_v36 = vmul.f32 %v3089_v47, %v4755_v43  ;;  %v906_v13 = vsel %vm806_vm2, %v775_v10, 0.0 }
 0x15b   :  { %910 = vadd.xlane.f32.xlu1 %v909_v0  ;;  %898 = vadd.xlane.f32.xlu0 %v897_v56  ;;  %v912_v0 = vsel %vm806_vm2, %v777_v49, 0.0  ;;  %v900_v56 = vsel %vm806_vm2, %v773_v42, 0.0  ;;  %v894_v16 = vsel %vm806_vm2, %v771_v36, 0.0 }
 0x15f   :  { %904 = vadd.xlane.f32.xlu1 %v903_v38  ;;  %892 = vadd.xlane.f32.xlu0 %v891_v37  ;;  %v3708_v38 = vld [vmem:[#allocation2] ss:$0 sm:$0xff] }
 0x163   :  { %913 = vadd.xlane.f32.xlu1 %v912_v0  ;;  %901 = vadd.xlane.f32.xlu0 %v900_v56 }
 0x167   :  { %907 = vadd.xlane.f32.xlu1 %v906_v13  ;;  %895 = vadd.xlane.f32.xlu0 %v894_v16 }
 0x178   :  { %v923_v37 = vpop.xlane.xlu1 %922  ;;  %v815_v42 = vpop.xlane.xlu0 %814 }
 0x179   :  { %v3711_v49 = vadd.f32 %v3708_v38, %v923_v37  ;;  %v3714_v55 = vadd.f32 %v3708_v38, %v815_v42 }
 0x17b   :  { %v1108_v47 = vand.u32 2147483647, %v3711_v49  ;;  %v1072_v0 = vand.u32 2147483647, %v3714_v55  ;;  %vm1456_vm3 = vcmp.ge.f32.partialorder %v3714_v55, 0.0  ;;  %vm1492_vm4 = vcmp.ge.f32.partialorder %v3711_v49, 0.0 }
 0x17c   :  { %v917_v56 = vpop.xlane.xlu1 %916  ;;  %v809_v10 = vpop.xlane.xlu0 %808 }
 0x17d   :  { %v1136_v43 = vsub.f32 0.0, %v1072_v0  ;;  %v3719_v36 = vadd.f32 %v3708_v38, %v917_v56  ;;  %v3722_v13 = vadd.f32 %v3708_v38, %v809_v10  ;;  %v1172_v16 = vsub.f32 0.0, %v1108_v47 }
 0x17f   :  { %v1202_v59 = vmul.f32 1.442695, %v1136_v43  ;;  %v1070_v37 = vand.u32 2147483647, %v3722_v13  ;;  %v1106_v50 = vand.u32 2147483647, %v3719_v36 }
 0x180   :  { %v926_v35 = vpop.xlane.xlu1 %925  ;;  %v818_v42 = vpop.xlane.xlu0 %817  ;;  %v1274_v4 = vmul.f32 1.442695, %v1172_v16  ;;  %vm1454_vm5 = vcmp.ge.f32.partialorder %v3722_v13, 0.0  ;;  %vm1490_vm6 = vcmp.ge.f32.partialorder %v3719_v36, 0.0 }
 0x181   :  { %v3727_v19 = vadd.f32 %v3708_v38, %v818_v42  ;;  %2596 = vpow2.f32 %v1202_v59  ;;  %v1134_v0 = vsub.f32 0.0, %v1070_v37  ;;  %v3730_v56 = vadd.f32 %v3708_v38, %v926_v35 }
 0x182   :  { %v1170_v15 = vsub.f32 0.0, %v1106_v50  ;;  %2598 = vpow2.f32 %v1274_v4 }
 0x183   :  { %v1198_v58 = vmul.f32 1.442695, %v1134_v0  ;;  %v1073_v10 = vand.u32 2147483647, %v3727_v19  ;;  %v1109_v59 = vand.u32 2147483647, %v3730_v56 }
 0x184   :  { %v920_v47 = vpop.xlane.xlu1 %919  ;;  %v812_v43 = vpop.xlane.xlu0 %811  ;;  %v1270_v37 = vmul.f32 1.442695, %v1170_v15  ;;  %vm1457_vm7 = vcmp.ge.f32.partialorder %v3727_v19, 0.0  ;;  %vm1493_vm8 = vcmp.ge.f32.partialorder %v3730_v56, 0.0 }
 0x185   :  { %v3734_v63 = vadd.f32 %v3708_v38, %v812_v43  ;;  %v1137_v20 = vsub.f32 0.0, %v1073_v10  ;;  %v3737_v42 = vadd.f32 %v3708_v38, %v920_v47  ;;  %2600 = vpow2.f32 %v1198_v58 }
 0x186   :  { %v1173_v43 = vsub.f32 0.0, %v1109_v59  ;;  %2602 = vpow2.f32 %v1270_v37 }
 0x187   :  { %v1071_v0 = vand.u32 2147483647, %v3734_v63  ;;  %v1204_v28 = vmul.f32 1.442695, %v1137_v20  ;;  %v1107_v5 = vand.u32 2147483647, %v3737_v42 }
 0x188   :  { %v935_v16 = vpop.xlane.xlu1 %934  ;;  %v827_v35 = vpop.xlane.xlu0 %826  ;;  %v1276_v20 = vmul.f32 1.442695, %v1173_v43  ;;  %vm1455_vm9 = vcmp.ge.f32.partialorder %v3734_v63, 0.0  ;;  %vm1491_vm11 = vcmp.ge.f32.partialorder %v3737_v42, 0.0 }
 0x189   :  { %v3743_v50 = vadd.f32 %v3708_v38, %v827_v35  ;;  %v3746_v10 = vadd.f32 %v3708_v38, %v935_v16  ;;  %v1135_v34 = vsub.f32 0.0, %v1071_v0  ;;  %2604 = vpow2.f32 %v1204_v28 }
 0x18a   :  { %v1171_v15 = vsub.f32 0.0, %v1107_v5 }
 0x18b   :  { %v2597_v4 = vpop.eup %2596  ;;  %v1076_v45 = vand.u32 2147483647, %v3743_v50  ;;  %v1112_v35 = vand.u32 2147483647, %v3746_v10  ;;  %v1200_v27 = vmul.f32 1.442695, %v1135_v34 }
 0x18c   :  { %v929_v47 = vpop.xlane.xlu1 %928  ;;  %v821_v58 = vpop.xlane.xlu0 %820  ;;  %v1328_v25 = vadd.f32 1.0, %v2597_v4  ;;  %v1272_v28 = vmul.f32 1.442695, %v1171_v15  ;;  %vm1460_vm10 = vcmp.ge.f32.partialorder %v3743_v50, 0.0  ;;  %vm1496_vm13 = vcmp.ge.f32.partialorder %v3746_v10, 0.0 }
 0x18d   :  { %v3749_v8 = vpop.eup %2598  ;;  %v3753_v59 = vadd.f32 %v3708_v38, %v821_v58  ;;  %v3758_v37 = vadd.f32 %v3708_v38, %v929_v47  ;;  %v1140_v5 = vsub.f32 0.0, %v1076_v45  ;;  %v1176_v14 = vsub.f32 0.0, %v1112_v35 }
 0x18e   :  { %2606 = vrcp.f32 %v1328_v25  ;;  %v1364_v0 = vadd.f32 1.0, %v3749_v8 }
 0x18f   :  { %v3755_v30 = vpop.eup %2600  ;;  %2608 = vpow2.f32 %v1276_v20  ;;  %v1074_v58 = vand.u32 2147483647, %v3753_v59  ;;  %v1110_v6 = vand.u32 2147483647, %v3758_v37  ;;  %v1210_v34 = vmul.f32 1.442695, %v1140_v5 }
 0x190   :  { %v938_v18 = vpop.xlane.xlu1 %937  ;;  %v830_v16 = vpop.xlane.xlu0 %829  ;;  %v1326_v43 = vadd.f32 1.0, %v3755_v30  ;;  %2610 = vpow2.f32 %v1200_v27  ;;  %v1282_v20 = vmul.f32 1.442695, %v1176_v14  ;;  %vm1458_vm12 = vcmp.ge.f32.partialorder %v3753_v59, 0.0 }
 0x191   :  { %v3765_v25 = vadd.f32 %v3708_v38, %v830_v16  ;;  %2612 = vpow2.f32 %v1272_v28  ;;  %v3767_v15 = vpop.eup %2602  ;;  %v1138_v35 = vsub.f32 0.0, %v1074_v58  ;;  %v3772_v2 = vadd.f32 %v3708_v38, %v938_v18 }
 0x192   :  { %2614 = vrcp.f32 %v1364_v0  ;;  %v1174_v62 = vsub.f32 0.0, %v1110_v6  ;;  %v1362_v16 = vadd.f32 1.0, %v3767_v15  ;;  %vm1494_vm14 = vcmp.ge.f32.partialorder %v3758_v37, 0.0 }
 0x193   :  { %v3769_v45 = vpop.eup %2604  ;;  %2616 = vrcp.f32 %v1326_v43  ;;  %v1077_v22 = vand.u32 2147483647, %v3765_v25  ;;  %v1206_v43 = vmul.f32 1.442695, %v1138_v35  ;;  %v1113_v14 = vand.u32 2147483647, %v3772_v2 }
 0x194   :  { %v932_v17 = vpop.xlane.xlu1 %931  ;;  %v824_v47 = vpop.xlane.xlu0 %823  ;;  %2618 = vpow2.f32 %v1210_v34  ;;  %v1329_v0 = vadd.f32 1.0, %v3769_v45  ;;  %v1278_v26 = vmul.f32 1.442695, %v1174_v62  ;;  %vm1461_vm15 = vcmp.ge.f32.partialorder %v3765_v25, 0.0 }
 0x195   :  { %v3777_v28 = vadd.f32 %v3708_v38, %v824_v47  ;;  %2620 = vpow2.f32 %v1282_v20  ;;  %v3782_v18 = vadd.f32 %v3708_v38, %v932_v17  ;;  %v1141_v60 = vsub.f32 0.0, %v1077_v22 }
 0x196   :  { %2622 = vrcp.f32 %v1362_v16  ;;  %v1177_v3 = vsub.f32 0.0, %v1113_v14  ;;  %vm1497_vm0 = vcmp.ge.f32.partialorder %v3772_v2, 0.0 }
 0x197   :  { %v1075_v34 = vand.u32 2147483647, %v3777_v28  ;;  %2624 = vrcp.f32 %v1329_v0  ;;  %v1111_v22 = vand.u32 2147483647, %v3782_v18 }
 0x198   :  { %v947_v27 = vpop.xlane.xlu1 %946  ;;  %v2607_v5 = vpop.eup %2606  ;;  %2626 = vpow2.f32 %v1206_v43 }
 0x199   :  { %v839_v58 = vpop.xlane.xlu0 %838  ;;  %v3784_v54 = vpop.eup %2608  ;;  %v1520_v47 = vmul.f32 %v2607_v5, %v2597_v4  ;;  %2628 = vpow2.f32 %v1278_v26  ;;  %v1212_v4 = vmul.f32 1.442695, %v1141_v60  ;;  %v1139_v0 = vsub.f32 0.0, %v1075_v34 }
 0x19a   :  { %v3787_v7 = vpop.eup %2610  ;;  %v3791_v20 = vadd.f32 %v3708_v38, %v839_v58  ;;  %v1365_v35 = vadd.f32 1.0, %v3784_v54  ;;  %v3804_v43 = vadd.f32 %v3708_v38, %v947_v27  ;;  %v1284_v60 = vmul.f32 1.442695, %v1177_v3 }
 0x19b   :  { %v3793_v17 = vpop.eup %2612  ;;  %v1327_v1 = vadd.f32 1.0, %v3787_v7  ;;  %v1584_v58 = vsel %vm1456_vm3, %v2607_v5, %v1520_v47  ;;  %v1175_v26 = vsub.f32 0.0, %v1111_v22  ;;  %v1208_v47 = vmul.f32 1.442695, %v1139_v0 }
 0x19c   :  { %v941_v6 = vpop.xlane.xlu1 %940  ;;  %v2615_v16 = vpop.eup %2614  ;;  %v1080_v14 = vand.u32 2147483647, %v3791_v20  ;;  %v1648_v51 = vadd.f32 1.0, %v1584_v58  ;;  %2630 = vrcp.f32 %v1365_v35  ;;  %v1363_v55 = vadd.f32 1.0, %v3793_v17 }
 0x19d   :  { %v2617_v12 = vpop.eup %2616  ;;  %v833_v24 = vpop.xlane.xlu0 %832  ;;  %v1556_v61 = vmul.f32 %v2615_v16, %v3749_v8  ;;  %2632 = vpow2.f32 %v1212_v4  ;;  %v1116_v22 = vand.u32 2147483647, %v3804_v43  ;;  %vm1459_vm3 = vcmp.ge.f32.partialorder %v3777_v28, 0.0 }
 0x19e   :  { %v3807_v41 = vpop.eup %2618  ;;  %1722 = vperm.xlu1 %2559, %v1648_v51   ;;  %v1518_v27 = vmul.f32 %v2617_v12, %v3755_v30  ;;  %2634 = vrcp.f32 %v1327_v1  ;;  %v3818_v35 = vadd.f32 %v3708_v38, %v833_v24  ;;  %v1144_v58 = vsub.f32 0.0, %v1080_v14 }
 0x19f   :  { %v3815_v5 = vpop.eup %2620  ;;  %v1620_v3 = vsel %vm1492_vm4, %v2615_v16, %v1556_v61  ;;  %v1332_v8 = vadd.f32 1.0, %v3807_v41  ;;  %2636 = vpow2.f32 %v1284_v60  ;;  %v1280_v51 = vmul.f32 1.442695, %v1175_v26 }
 0x1a0   :  { %v3797_v62 = vpop.xlane.xlu1 %949  ;;  %v1684_v44 = vadd.f32 1.0, %v1620_v3  ;;  %v2623_v4 = vpop.eup %2622  ;;  %v3825_v30 = vadd.f32 %v3708_v38, %v941_v6  ;;  %2638 = vrcp.f32 %v1363_v55  ;;  %v1368_v49 = vadd.f32 1.0, %v3815_v5 }
 0x1a1   :  { %v842_v1 = vpop.xlane.xlu0 %841  ;;  %v2625_v24 = vpop.eup %2624  ;;  %v1582_v61 = vsel %vm1454_vm5, %v2617_v12, %v1518_v27  ;;  %2640 = vpow2.f32 %v1208_v47  ;;  %v1078_v14 = vand.u32 2147483647, %v3818_v35  ;;  %v1180_v6 = vsub.f32 0.0, %v1116_v22 }
 0x1a2   :  { %1902 = vperm.xlu0 %2560, %v1684_v44   ;;  %v3832_v16 = vpop.eup %2626  ;;  %v1646_v60 = vadd.f32 1.0, %v1582_v61  ;;  %2642 = vrcp.f32 %v1332_v8  ;;  %v1218_v3 = vmul.f32 1.442695, %v1144_v58  ;;  %v1114_v55 = vand.u32 2147483647, %v3825_v30 }
 0x1a3   :  { %v3835_v26 = vpop.eup %2628  ;;  %2644 = vpow2.f32 %v1280_v51  ;;  %v3840_v44 = vadd.f32 %v3708_v38, %v842_v1  ;;  %v1554_v12 = vmul.f32 %v2623_v4, %v3767_v15  ;;  %v1330_v27 = vadd.f32 1.0, %v3832_v16 }
 0x1a4   :  { %v3810_v34 = vpop.xlane.xlu1 %943  ;;  %2646 = vrcp.f32 %v1368_v49  ;;  %v1521_v47 = vmul.f32 %v2625_v24, %v3769_v45  ;;  %v1366_v22 = vadd.f32 1.0, %v3835_v26  ;;  %v1142_v58 = vsub.f32 0.0, %v1078_v14 }
 0x1a5   :  { %v3851_v51 = vadd.f32 %v3708_v38, %v3797_v62  ;;  %v836_v1 = vpop.xlane.xlu0 %835  ;;  %v1618_v15 = vsel %vm1490_vm6, %v2623_v4, %v1554_v12  ;;  %v1290_v49 = vmul.f32 1.442695, %v1180_v6  ;;  %2648 = vpow2.f32 %v1218_v3 }
 0x1a6   :  { %1712 = vperm.xlu0 %2560, %v1646_v60   ;;  %v2631_v8 = vpop.eup %2630  ;;  %v1178_v60 = vsub.f32 0.0, %v1114_v55  ;;  %v1081_v45 = vand.u32 2147483647, %v3840_v44  ;;  %v1682_v48 = vadd.f32 1.0, %v1618_v15  ;;  %v1585_v14 = vsel %vm1457_vm7, %v2625_v24, %v1521_v47 }
 0x1a7   :  { %v3855_v61 = vpop.eup %2632  ;;  %2650 = vrcp.f32 %v1330_v27  ;;  %v3862_v62 = vadd.f32 %v3708_v38, %v836_v1  ;;  %v1649_v36 = vadd.f32 1.0, %v1585_v14  ;;  %v1214_v6 = vmul.f32 1.442695, %v1142_v58 }
 0x1a8   :  { %v3827_v0 = vpop.xlane.xlu1 %958  ;;  %v2635_v31 = vpop.eup %2634  ;;  %2652 = vrcp.f32 %v1366_v22  ;;  %v1117_v3 = vand.u32 2147483647, %v3851_v51  ;;  %v1333_v24 = vadd.f32 1.0, %v3855_v61  ;;  %v3873_v12 = vadd.f32 %v3708_v38, %v3810_v34 }
 0x1a9   :  { %v3864_v4 = vpop.eup %2636  ;;  %1727 = vperm.xlu1 %2559, %v1649_v36   ;;  %v1557_v27 = vmul.f32 %v2631_v8, %v3784_v54  ;;  %v1519_v47 = vmul.f32 %v2635_v31, %v3787_v7  ;;  %2654 = vpow2.f32 %v1290_v49  ;;  %v1145_v22 = vsub.f32 0.0, %v1081_v45  ;;  %v851_v58 = vpop.xlane.xlu0 %850 }
 0x1aa   :  { %1892 = vperm.xlu0 %2560, %v1682_v48   ;;  %v2639_v19 = vpop.eup %2638  ;;  %v1286_v48 = vmul.f32 1.442695, %v1178_v60  ;;  %v1369_v14 = vadd.f32 1.0, %v3864_v4  ;;  %v1079_v29 = vand.u32 2147483647, %v3862_v62  ;;  %2656 = vpow2.f32 %v1214_v6 }
 0x1ab   :  { %v3877_v1 = vpop.eup %2640  ;;  %v1621_v34 = vsel %vm1493_vm8, %v2631_v8, %v1557_v27  ;;  %v1583_v54 = vsel %vm1455_vm9, %v2635_v31, %v1519_v47  ;;  %v1181_v36 = vsub.f32 0.0, %v1117_v3  ;;  %2658 = vrcp.f32 %v1333_v24 }
 0x1ac   :  { %v3843_v13 = vpop.xlane.xlu1 %952  ;;  %v2643_v15 = vpop.eup %2642  ;;  %v1685_v21 = vadd.f32 1.0, %v1621_v34  ;;  %v1647_v49 = vadd.f32 1.0, %v1583_v54  ;;  %v1331_v45 = vadd.f32 1.0, %v3877_v1  ;;  %v1115_v39 = vand.u32 2147483647, %v3873_v12 }
 0x1ad   :  { %v3886_v7 = vpop.eup %2644  ;;  %v1555_v11 = vmul.f32 %v2639_v19, %v3793_v17  ;;  %2660 = vpow2.f32 %v1286_v48  ;;  %v1220_v56 = vmul.f32 1.442695, %v1145_v22  ;;  %v1524_v63 = vmul.f32 %v2643_v15, %v3807_v41 }
 0x1ae   :  { %v2647_v60 = vpop.eup %2646  ;;  %1907 = vperm.xlu0 %2560, %v1685_v21   ;;  %1717 = vperm.xlu1 %2559, %v1647_v49   ;;  %2662 = vrcp.f32 %v1369_v14  ;;  %v1367_v6 = vadd.f32 1.0, %v3886_v7  ;;  %v1143_v3 = vsub.f32 0.0, %v1079_v29  ;;  %v3899_v24 = vadd.f32 %v3708_v38, %v851_v58  ;;  %v845_v21 = vpop.xlane.xlu0 %844 }
 0x1af   :  { %v3895_v8 = vpop.eup %2648  ;;  %v1292_v17 = vmul.f32 1.442695, %v1181_v36  ;;  %v3903_v42 = vadd.f32 %v3708_v38, %v3843_v13  ;;  %v1619_v27 = vsel %vm1491_vm11, %v2639_v19, %v1555_v11  ;;  %v1588_v41 = vsel %vm1460_vm10, %v2643_v15, %v1524_v63 }
 0x1b0   :  { %v3868_v55 = vpop.xlane.xlu1 %961  ;;  %2664 = vrcp.f32 %v1331_v45  ;;  %v1179_v48 = vsub.f32 0.0, %v1115_v39  ;;  %v1683_v22 = vadd.f32 1.0, %v1619_v27  ;;  %v1652_v14 = vadd.f32 1.0, %v1588_v41 }
 0x1b1   :  { %v2651_v47 = vpop.eup %2650  ;;  %v1336_v29 = vadd.f32 1.0, %v3895_v8  ;;  %2666 = vpow2.f32 %v1220_v56  ;;  %v1216_v58 = vmul.f32 1.442695, %v1143_v3  ;;  %v1084_v13 = vand.u32 2147483647, %v3899_v24 }
 0x1b2   :  { %v2653_v34 = vpop.eup %2652  ;;  %2668 = vrcp.f32 %v1367_v6  ;;  %1897 = vperm.xlu0 %2560, %v1683_v22   ;;  %1742 = vperm.xlu1 %2559, %v1652_v14   ;;  %v1118_v50 = vand.u32 2147483647, %v3903_v42  ;;  %v3914_v39 = vadd.f32 %v3708_v38, %v845_v21  ;;  %v1560_v19 = vmul.f32 %v2647_v60, %v3815_v5  ;;  %v854_v45 = vpop.xlane.xlu0 %853 }
 0x1b3   :  { %v3910_v11 = vpop.eup %2654  ;;  %v1522_v15 = vmul.f32 %v2651_v47, %v3832_v16  ;;  %2670 = vpow2.f32 %v1292_v17  ;;  %v1288_v36 = vmul.f32 1.442695, %v1179_v48  ;;  %v1558_v56 = vmul.f32 %v2653_v34, %v3835_v26 }
 0x1b4   :  { %v3893_v31 = vpop.xlane.xlu1 %955  ;;  %v3920_v49 = vpop.eup %2656  ;;  %2672 = vrcp.f32 %v1336_v29  ;;  %v1148_v6 = vsub.f32 0.0, %v1084_v13  ;;  %v1624_v5 = vsel %vm1496_vm13, %v2647_v60, %v1560_v19  ;;  %v1182_v17 = vsub.f32 0.0, %v1118_v50 }
 0x1b5   :  { %v2659_v63 = vpop.eup %2658  ;;  %2674 = vpow2.f32 %v1216_v58  ;;  %v1586_v16 = vsel %vm1458_vm12, %v2651_v47, %v1522_v15  ;;  %v1082_v21 = vand.u32 2147483647, %v3914_v39  ;;  %v1688_v27 = vadd.f32 1.0, %v1624_v5 }
 0x1b6   :  { %v1650_v10 = vadd.f32 1.0, %v1586_v16  ;;  %v1372_v48 = vadd.f32 1.0, %v3910_v11  ;;  %2676 = vpow2.f32 %v1288_v36  ;;  %v3933_v26 = vadd.f32 %v3708_v38, %v854_v45 }
 0x1b7   :  { %v3927_v3 = vpop.eup %2660  ;;  %v1334_v60 = vadd.f32 1.0, %v3920_v49  ;;  %1922 = vperm.xlu0 %2560, %v1688_v27   ;;  %v1622_v59 = vsel %vm1494_vm14, %v2653_v34, %v1558_v56  ;;  %v1525_v47 = vmul.f32 %v2659_v63, %v3855_v61  ;;  %v1226_v29 = vmul.f32 1.442695, %v1148_v6  ;;  %v848_v61 = vpop.xlane.xlu0 %847 }
 0x1b8   :  { %v3918_v54 = vpop.xlane.xlu1 %970  ;;  %v2663_v41 = vpop.eup %2662  ;;  %1732 = vperm.xlu1 %2559, %v1650_v10   ;;  %v1294_v13 = vmul.f32 1.442695, %v1182_v17  ;;  %v1146_v50 = vsub.f32 0.0, %v1082_v21  ;;  %v1686_v19 = vadd.f32 1.0, %v1622_v59  ;;  %2678 = vrcp.f32 %v1372_v48 }
 0x1b9   :  { %v1589_v15 = vsel %vm1461_vm15, %v2659_v63, %v1525_v47  ;;  %v1085_v45 = vand.u32 2147483647, %v3933_v26  ;;  %v1370_v34 = vadd.f32 1.0, %v3927_v3  ;;  %2680 = vrcp.f32 %v1334_v60 }
 0x1ba   :  { %v2665_v14 = vpop.eup %2664  ;;  %v1653_v37 = vadd.f32 1.0, %v1589_v15  ;;  %v1561_v56 = vmul.f32 %v2663_v41, %v3864_v4  ;;  %2682 = vpow2.f32 %v1226_v29  ;;  %v1222_v16 = vmul.f32 1.442695, %v1146_v50 }
 0x1bb   :  { %v3941_v58 = vpop.eup %2666  ;;  %1912 = vperm.xlu0 %2560, %v1686_v19   ;;  %v1523_v25 = vmul.f32 %v2665_v14, %v3877_v1  ;;  %2684 = vpow2.f32 %v1294_v13  ;;  %v1149_v4 = vsub.f32 0.0, %v1085_v45  ;;  %v3960_v2 = vadd.f32 %v3708_v38, %v3893_v31  ;;  %v3971_v47 = vpop.xlane.xlu0 %862 }
 0x1bc   :  { %v3939_v22 = vpop.xlane.xlu1 %964  ;;  %v2669_v36 = vpop.eup %2668  ;;  %v1337_v5 = vadd.f32 1.0, %v3941_v58  ;;  %1747 = vperm.xlu1 %2559, %v1653_v37   ;;  %v1625_v17 = vsel %vm1497_vm0, %v2663_v41, %v1561_v56  ;;  %vm1464_vm4 = vcmp.ge.f32.partialorder %v3791_v20, 0.0  ;;  %2686 = vrcp.f32 %v1370_v34 }
 0x1bd   :  { %v3948_v6 = vpop.eup %2670  ;;  %v1689_v10 = vadd.f32 1.0, %v1625_v17  ;;  %v1587_v48 = vsel %vm1459_vm3, %v2665_v14, %v1523_v25  ;;  %v3967_v41 = vadd.f32 %v3708_v38, %v848_v61  ;;  %v1559_v59 = vmul.f32 %v2669_v36, %v3886_v7 }
 0x1be   :  { %v2673_v63 = vpop.eup %2672  ;;  %v1651_v1 = vadd.f32 1.0, %v1587_v48  ;;  %v1373_v28 = vadd.f32 1.0, %v3948_v6  ;;  %2688 = vrcp.f32 %v1337_v5  ;;  %vm1495_vm5 = vcmp.ge.f32.partialorder %v3782_v18, 0.0 }
 0x1bf   :  { %v3956_v27 = vpop.eup %2674  ;;  %1927 = vperm.xlu0 %2560, %v1689_v10   ;;  %v1528_v14 = vmul.f32 %v2673_v63, %v3895_v8  ;;  %2690 = vpow2.f32 %v1222_v16  ;;  %v1228_v29 = vmul.f32 1.442695, %v1149_v4  ;;  %v1119_v13 = vand.u32 2147483647, %v3960_v2 }
 0x1c0   :  { %v3954_v21 = vpop.xlane.xlu1 %973  ;;  %v3963_v60 = vpop.eup %2676  ;;  %v1335_v31 = vadd.f32 1.0, %v3956_v27  ;;  %1737 = vperm.xlu1 %2559, %v1651_v1   ;;  %v3979_v19 = vadd.f32 %v3708_v38, %v3827_v0  ;;  %v1623_v7 = vsel %vm1495_vm5, %v2669_v36, %v1559_v59  ;;  %2692 = vrcp.f32 %v1373_v28 }
 0x1c1   :  { %v1371_v50 = vadd.f32 1.0, %v3963_v60  ;;  %v1592_v15 = vsel %vm1464_vm4, %v2673_v63, %v1528_v14  ;;  %v1083_v8 = vand.u32 2147483647, %v3967_v41  ;;  %v1687_v18 = vadd.f32 1.0, %v1623_v7  ;;  %v857_v36 = vpop.xlane.xlu0 %856 }
 0x1c2   :  { %v2679_v37 = vpop.eup %2678  ;;  %v1656_v34 = vadd.f32 1.0, %v1592_v15  ;;  %2694 = vrcp.f32 %v1335_v31  ;;  %v3986_v56 = vadd.f32 %v3708_v38, %v3868_v55  ;;  %v1183_v0 = vsub.f32 0.0, %v1119_v13 }
 0x1c3   :  { %v2681_v61 = vpop.eup %2680  ;;  %2696 = vpow2.f32 %v1228_v29  ;;  %1917 = vperm.xlu0 %2560, %v1687_v18   ;;  %vm1500_vm6 = vcmp.ge.f32.partialorder %v3804_v43, 0.0  ;;  %v1564_v25 = vmul.f32 %v2679_v37, %v3910_v11  ;;  %vm1462_vm7 = vcmp.ge.f32.partialorder %v3818_v35, 0.0 }
 0x1c4   :  { %v968_v45 = vpop.xlane.xlu1 %967  ;;  %v3988_v5 = vpop.eup %2682  ;;  %1762 = vperm.xlu1 %2559, %v1656_v34   ;;  %2698 = vrcp.f32 %v1371_v50  ;;  %v1120_v63 = vand.u32 2147483647, %v3979_v19  ;;  %v1147_v55 = vsub.f32 0.0, %v1083_v8  ;;  %v1526_v16 = vmul.f32 %v2681_v61, %v3920_v49 }
 0x1c5   :  { %v3990_v20 = vpop.eup %2684  ;;  %v1340_v4 = vadd.f32 1.0, %v3988_v5  ;;  %v1121_v10 = vand.u32 2147483647, %v3986_v56  ;;  %v4001_v48 = vadd.f32 %v3708_v38, %v3939_v22  ;;  %v1628_v43 = vsel %vm1500_vm6, %v2679_v37, %v1564_v25 }
 0x1c6   :  { %v2687_v17 = vpop.eup %2686  ;;  %v1296_v28 = vmul.f32 1.442695, %v1183_v0  ;;  %v4006_v35 = vadd.f32 %v3708_v38, %v857_v36  ;;  %v1692_v59 = vadd.f32 1.0, %v1628_v43  ;;  %v1590_v31 = vsel %vm1462_vm7, %v2681_v61, %v1526_v16  ;;  %v4020_v61 = vpop.xlane.xlu0 %865 }
 0x1c7   :  { %vm1498_vm8 = vcmp.ge.f32.partialorder %v3825_v30, 0.0  ;;  %v1374_v49 = vadd.f32 1.0, %v3990_v20  ;;  %v1654_v14 = vadd.f32 1.0, %v1590_v31  ;;  %vm1465_vm9 = vcmp.ge.f32.partialorder %v3840_v44, 0.0 }
 0x1c8   :  { %v4003_v1 = vpop.xlane.xlu1 %982  ;;  %v2689_v11 = vpop.eup %2688  ;;  %v1224_v22 = vmul.f32 1.442695, %v1147_v55  ;;  %1942 = vperm.xlu0 %2560, %v1692_v59   ;;  %v4014_v13 = vadd.f32 %v3708_v38, %v968_v45  ;;  %v1562_v50 = vmul.f32 %v2687_v17, %v3927_v3  ;;  %v1184_v7 = vsub.f32 0.0, %v1120_v63 }
 0x1c9   :  { %v4010_v29 = vpop.eup %2690  ;;  %2700 = vrcp.f32 %v1340_v4  ;;  %v1122_v15 = vand.u32 2147483647, %v4001_v48  ;;  %1752 = vperm.xlu1 %2559, %v1654_v14   ;;  %v1529_v37 = vmul.f32 %v2689_v11, %v3941_v58  ;;  %v1185_v18 = vsub.f32 0.0, %v1121_v10 }
 0x1ca   :  { %v2693_v8 = vpop.eup %2692  ;;  %2702 = vpow2.f32 %v1296_v28  ;;  %v1086_v34 = vand.u32 2147483647, %v4006_v35  ;;  %v1626_v45 = vsel %vm1498_vm8, %v2687_v17, %v1562_v50  ;;  %v1338_v3 = vadd.f32 1.0, %v4010_v29  ;;  %v4039_v31 = vpop.xlane.xlu0 %859 }
 0x1cb   :  { %2704 = vrcp.f32 %v1374_v49  ;;  %v1690_v36 = vadd.f32 1.0, %v1626_v45  ;;  %v1593_v25 = vsel %vm1465_vm9, %v2689_v11, %v1529_v37  ;;  %v1123_v55 = vand.u32 2147483647, %v4014_v13 }
 0x1cc   :  { %v2695_v0 = vpop.eup %2694  ;;  %v977_v63 = vpop.xlane.xlu1 %976  ;;  %2706 = vpow2.f32 %v1224_v22  ;;  %v1657_v16 = vadd.f32 1.0, %v1593_v25  ;;  %vm1501_vm10 = vcmp.ge.f32.partialorder %v3851_v51, 0.0  ;;  %vm1463_vm11 = vcmp.ge.f32.partialorder %v3862_v62, 0.0 }
 0x1cd   :  { %v4027_v58 = vpop.eup %2696  ;;  %v1186_v30 = vsub.f32 0.0, %v1122_v15  ;;  %1932 = vperm.xlu0 %2560, %v1690_v36   ;;  %v1298_v17 = vmul.f32 1.442695, %v1184_v7  ;;  %v1150_v10 = vsub.f32 0.0, %v1086_v34  ;;  %v1565_v44 = vmul.f32 %v2693_v8, %v3948_v6 }
 0x1ce   :  { %v2699_v4 = vpop.eup %2698  ;;  %1767 = vperm.xlu1 %2559, %v1657_v16   ;;  %v1527_v43 = vmul.f32 %v2695_v0, %v3956_v27  ;;  %2708 = vrcp.f32 %v1338_v3  ;;  %v1300_v11 = vmul.f32 1.442695, %v1185_v18  ;;  %v1341_v28 = vadd.f32 1.0, %v4027_v58 }
 0x1cf   :  { %v4037_v59 = vadd.f32 %v3708_v38, %v3918_v54  ;;  %v1187_v51 = vsub.f32 0.0, %v1123_v55  ;;  %v1629_v62 = vsel %vm1501_vm10, %v2693_v8, %v1565_v44  ;;  %v1563_v14 = vmul.f32 %v2699_v4, %v3963_v60 }
 0x1d0   :  { %v1591_v49 = vsel %vm1463_vm11, %v2695_v0, %v1527_v43  ;;  %v1302_v22 = vmul.f32 1.442695, %v1186_v30  ;;  %v1693_v50 = vadd.f32 1.0, %v1629_v62  ;;  %v4042_v7 = vpop.xlane.xlu1 %985  ;;  %2710 = vpow2.f32 %v1298_v17 }
 0x1d1   :  { %v1655_v6 = vadd.f32 1.0, %v1591_v49  ;;  %v1230_v27 = vmul.f32 1.442695, %v1150_v10  ;;  %vm1499_vm12 = vcmp.ge.f32.partialorder %v3873_v12, 0.0  ;;  %2712 = vpow2.f32 %v1300_v11  ;;  %v4054_v12 = vpop.xlane.xlu0 %874 }
 0x1d2   :  { %v1124_v54 = vand.u32 2147483647, %v4037_v59  ;;  %v4048_v37 = vadd.f32 %v3708_v38, %v3954_v21  ;;  %1947 = vperm.xlu0 %2560, %v1693_v50   ;;  %2714 = vrcp.f32 %v1341_v28  ;;  %v1304_v8 = vmul.f32 1.442695, %v1187_v51 }
 0x1d3   :  { %v2701_v15 = vpop.eup %2700  ;;  %1757 = vperm.xlu1 %2559, %v1655_v6   ;;  %v1627_v18 = vsel %vm1499_vm12, %v2699_v4, %v1563_v14  ;;  %2716 = vpow2.f32 %v1302_v22  ;;  %vm1468_vm13 = vcmp.ge.f32.partialorder %v3899_v24, 0.0  ;;  %v4061_v16 = vadd.f32 %v3708_v38, %v977_v63 }
 0x1d4   :  { %v4050_v60 = vpop.eup %2702  ;;  %v1691_v45 = vadd.f32 1.0, %v1627_v18  ;;  %2718 = vpow2.f32 %v1230_v27  ;;  %v1188_v3 = vsub.f32 0.0, %v1124_v54  ;;  %v1125_v21 = vand.u32 2147483647, %v4048_v37  ;;  %v980_v25 = vpop.xlane.xlu1 %979 }
 0x1d5   :  { %v2705_v34 = vpop.eup %2704  ;;  %v1532_v36 = vmul.f32 %v2701_v15, %v3988_v5  ;;  %v1375_v55 = vadd.f32 1.0, %v4050_v60  ;;  %2720 = vpow2.f32 %v1304_v8  ;;  %vm1502_vm14 = vcmp.ge.f32.partialorder %v3903_v42, 0.0  ;;  %v4069_v28 = vpop.xlane.xlu0 %868 }
 0x1d6   :  { %v4052_v0 = vpop.eup %2706  ;;  %1937 = vperm.xlu0 %2560, %v1691_v45   ;;  %v1566_v4 = vmul.f32 %v2705_v34, %v3990_v20  ;;  %v1306_v44 = vmul.f32 1.442695, %v1188_v3  ;;  %v1189_v43 = vsub.f32 0.0, %v1125_v21  ;;  %v1126_v5 = vand.u32 2147483647, %v4061_v16 }
 0x1d7   :  { %v1339_v17 = vadd.f32 1.0, %v4052_v0  ;;  %v1596_v10 = vsel %vm1468_vm13, %v2701_v15, %v1532_v36  ;;  %2722 = vrcp.f32 %v1375_v55  ;;  %vm1466_vm15 = vcmp.ge.f32.partialorder %v3914_v39, 0.0 }
 0x1d8   :  { %v2709_v30 = vpop.eup %2708  ;;  %v1660_v24 = vadd.f32 1.0, %v1596_v10  ;;  %v1630_v63 = vsel %vm1502_vm14, %v2705_v34, %v1566_v4  ;;  %v4075_v42 = vpop.xlane.xlu1 %994  ;;  %v4078_v22 = vadd.f32 %v3708_v38, %v980_v25  ;;  %v1308_v15 = vmul.f32 1.442695, %v1189_v43 }
 0x1d9   :  { %v1530_v20 = vmul.f32 %v2709_v30, %v4010_v29  ;;  %2724 = vrcp.f32 %v1339_v17  ;;  %v1694_v62 = vadd.f32 1.0, %v1630_v63  ;;  %v4087_v39 = vadd.f32 %v3708_v38, %v4003_v1  ;;  %v4094_v3 = vpop.xlane.xlu0 %877 }
 0x1da   :  { %v4066_v11 = vpop.eup %2710  ;;  %1782 = vperm.xlu1 %2559, %v1660_v24   ;;  %2726 = vpow2.f32 %v1306_v44  ;;  %v1190_v54 = vsub.f32 0.0, %v1126_v5  ;;  %v1127_v8 = vand.u32 2147483647, %v4078_v22  ;;  %vm1469_vm0 = vcmp.ge.f32.partialorder %v3933_v26, 0.0 }
 0x1db   :  { %v4072_v51 = vpop.eup %2712  ;;  %v1594_v14 = vsel %vm1466_vm15, %v2709_v30, %v1530_v20  ;;  %v1376_v6 = vadd.f32 1.0, %v4066_v11  ;;  %1952 = vperm.xlu0 %2560, %v1694_v62   ;;  %v1128_v55 = vand.u32 2147483647, %v4087_v39  ;;  %v4102_v30 = vadd.f32 %v3708_v38, %v4042_v7 }
 0x1dc   :  { %v2715_v49 = vpop.eup %2714  ;;  %v1658_v29 = vadd.f32 1.0, %v1594_v14  ;;  %v1377_v18 = vadd.f32 1.0, %v4072_v51  ;;  %v1191_v21 = vsub.f32 0.0, %v1127_v8  ;;  %v989_v25 = vpop.xlane.xlu1 %988  ;;  %v1310_v4 = vmul.f32 1.442695, %v1190_v54 }
 0x1dd   :  { %v4080_v50 = vpop.eup %2716  ;;  %2728 = vrcp.f32 %v1376_v6  ;;  %v1533_v1 = vmul.f32 %v2715_v49, %v4027_v58  ;;  %v1192_v58 = vsub.f32 0.0, %v1128_v55  ;;  %v1129_v5 = vand.u32 2147483647, %v4102_v30  ;;  %v4106_v63 = vpop.xlane.xlu0 %871 }
 0x1de   :  { %v4083_v27 = vpop.eup %2718  ;;  %1772 = vperm.xlu1 %2559, %v1658_v29   ;;  %v1378_v45 = vadd.f32 1.0, %v4080_v50  ;;  %2730 = vpow2.f32 %v1308_v15  ;;  %v1312_v26 = vmul.f32 1.442695, %v1191_v21  ;;  %vm1503_vm3 = vcmp.ge.f32.partialorder %v3960_v2, 0.0 }
 0x1df   :  { %v4091_v34 = vpop.eup %2720  ;;  %v1342_v36 = vadd.f32 1.0, %v4083_v27  ;;  %2732 = vrcp.f32 %v1377_v18  ;;  %v1597_v10 = vsel %vm1469_vm0, %v2715_v49, %v1533_v1  ;;  %v4113_v49 = vld [vmem:[#allocation2] ss:$0 sm:$0xff]  ;;  %v1314_v29 = vmul.f32 1.442695, %v1192_v58 }
 0x1e0   :  { %v1379_v17 = vadd.f32 1.0, %v4091_v34  ;;  %2734 = vrcp.f32 %v1378_v45  ;;  %v1661_v44 = vadd.f32 1.0, %v1597_v10  ;;  %v998_v7 = vpop.xlane.xlu1 %997  ;;  %v4116_v14 = vadd.f32 %v4113_v49, %v989_v25 }
 0x1e1   :  { %v2723_v24 = vpop.eup %2722  ;;  %2736 = vrcp.f32 %v1342_v36  ;;  %v1193_v15 = vsub.f32 0.0, %v1129_v5  ;;  %vm1467_vm4 = vcmp.ge.f32.partialorder %v3967_v41, 0.0  ;;  %v4122_v2 = vpop.xlane.xlu0 %886  ;;  %v4127_v36 = vadd.f32 %v4113_v49, %v4075_v42 }
 0x1e2   :  { %2738 = vpow2.f32 %v1310_v4  ;;  %1787 = vperm.xlu1 %2559, %v1661_v44   ;;  %v1567_v38 = vmul.f32 %v2723_v24, %v4050_v60  ;;  %v1130_v45 = vand.u32 2147483647, %v4116_v14  ;;  %vm1504_vm5 = vcmp.ge.f32.partialorder %v3979_v19, 0.0 }
 0x1e3   :  { %v2725_v43 = vpop.eup %2724  ;;  %2740 = vrcp.f32 %v1379_v17  ;;  %v1316_v41 = vmul.f32 1.442695, %v1193_v15  ;;  %v1132_v42 = vand.u32 2147483647, %v4127_v36  ;;  %vm1505_vm6 = vcmp.ge.f32.partialorder %v3986_v56, 0.0 }
 0x1e4   :  { %v4108_v20 = vpop.eup %2726  ;;  %2742 = vpow2.f32 %v1312_v26  ;;  %v1531_v62 = vmul.f32 %v2725_v43, %v4052_v0  ;;  %v1631_v6 = vsel %vm1503_vm3, %v2723_v24, %v1567_v38  ;;  %v992_v25 = vpop.xlane.xlu1 %991  ;;  %v1194_v4 = vsub.f32 0.0, %v1130_v45 }
 0x1e5   :  { %v1695_v54 = vadd.f32 1.0, %v1631_v6  ;;  %v1380_v60 = vadd.f32 1.0, %v4108_v20  ;;  %2744 = vpow2.f32 %v1314_v29  ;;  %v4137_v5 = vpop.xlane.xlu0 %880  ;;  %v4146_v19 = vadd.f32 %v4113_v49, %v3971_v47 }
 0x1e6   :  { %v1595_v0 = vsel %vm1467_vm4, %v2725_v43, %v1531_v62  ;;  %v1318_v58 = vmul.f32 1.442695, %v1194_v4  ;;  %v4140_v62 = vadd.f32 %v4113_v49, %v998_v7  ;;  %vm1506_vm7 = vcmp.ge.f32.partialorder %v4001_v48, 0.0 }
 0x1e7   :  { %v2729_v8 = vpop.eup %2728  ;;  %1957 = vperm.xlu0 %2560, %v1695_v54   ;;  %v1659_v1 = vadd.f32 1.0, %v1595_v0  ;;  %2746 = vrcp.f32 %v1380_v60  ;;  %v4151_v54 = vadd.f32 %v4113_v49, %v4039_v31  ;;  %v1196_v0 = vsub.f32 0.0, %v1132_v42 }
 0x1e8   :  { %v4120_v18 = vpop.eup %2730  ;;  %v1568_v24 = vmul.f32 %v2729_v8, %v4066_v11  ;;  %2748 = vpow2.f32 %v1316_v41  ;;  %v911_v29 = vpop.xlane.xlu1 %910  ;;  %v1133_v47 = vand.u32 2147483647, %v4140_v62  ;;  %vm1470_vm8 = vcmp.ge.f32.partialorder %v4006_v35, 0.0 }
 0x1e9   :  { %v2733_v21 = vpop.eup %2732  ;;  %v1381_v10 = vadd.f32 1.0, %v4120_v18  ;;  %1777 = vperm.xlu1 %2559, %v1659_v1   ;;  %v4161_v1 = vadd.f32 %v4113_v49, %v992_v25  ;;  %v4170_v41 = vadd.f32 %v4113_v49, %v4020_v61  ;;  %v4172_v56 = vpop.xlane.xlu0 %889  ;;  %vm1507_vm9 = vcmp.ge.f32.partialorder %v4014_v13, 0.0 }
 0x1ea   :  { %v2735_v55 = vpop.eup %2734  ;;  %v1632_v38 = vsel %vm1504_vm5, %v2729_v8, %v1568_v24  ;;  %v1569_v7 = vmul.f32 %v2733_v21, %v4072_v51  ;;  %v1087_v48 = vand.u32 2147483647, %v4151_v54  ;;  %v1322_v24 = vmul.f32 1.442695, %v1196_v0 }
 0x1eb   :  { %v2737_v17 = vpop.eup %2736  ;;  %2750 = vrcp.f32 %v1381_v10  ;;  %v1696_v6 = vadd.f32 1.0, %v1632_v38  ;;  %v1570_v15 = vmul.f32 %v2735_v55, %v4080_v50  ;;  %v1197_v42 = vsub.f32 0.0, %v1133_v47 }
 0x1ec   :  { %v4131_v26 = vpop.eup %2738  ;;  %v1534_v45 = vmul.f32 %v2737_v17, %v4083_v27  ;;  %2752 = vpow2.f32 %v1318_v58  ;;  %v1633_v50 = vsel %vm1505_vm6, %v2733_v21, %v1569_v7  ;;  %v905_v4 = vpop.xlane.xlu1 %904  ;;  %vm1508_vm10 = vcmp.ge.f32.partialorder %v4037_v59, 0.0 }
 0x1ed   :  { %v2741_v44 = vpop.eup %2740  ;;  %v1382_v11 = vadd.f32 1.0, %v4131_v26  ;;  %1962 = vperm.xlu0 %2560, %v1696_v6   ;;  %v1697_v31 = vadd.f32 1.0, %v1633_v50  ;;  %v1634_v27 = vsel %vm1506_vm7, %v2735_v55, %v1570_v15  ;;  %v1131_v55 = vand.u32 2147483647, %v4161_v1  ;;  %v4191_v47 = vpop.xlane.xlu0 %883 }
 0x1ee   :  { %v4135_v43 = vpop.eup %2742  ;;  %v1571_v8 = vmul.f32 %v2741_v44, %v4091_v34  ;;  %v1088_v34 = vand.u32 2147483647, %v4146_v19  ;;  %v1598_v21 = vsel %vm1470_vm8, %v2737_v17, %v1534_v45  ;;  %v1698_v58 = vadd.f32 1.0, %v1634_v27 }
 0x1ef   :  { %v1383_v60 = vadd.f32 1.0, %v4135_v43  ;;  %2754 = vrcp.f32 %v1382_v11  ;;  %v4165_v51 = vpop.eup %2744  ;;  %v1662_v35 = vadd.f32 1.0, %v1598_v21  ;;  %v4179_v17 = vadd.f32 %v4113_v49, %v911_v29 }
 0x1f0   :  { %v1635_v10 = vsel %vm1507_vm9, %v2741_v44, %v1571_v8  ;;  %v1384_v61 = vadd.f32 1.0, %v4165_v51  ;;  %v4187_v44 = vadd.f32 %v4113_v49, %v4069_v28  ;;  %v1195_v11 = vsub.f32 0.0, %v1131_v55 }
 0x1f1   :  { %v2747_v25 = vpop.eup %2746  ;;  %2756 = vrcp.f32 %v1383_v60  ;;  %1967 = vperm.xlu0 %2560, %v1697_v31   ;;  %1792 = vperm.xlu1 %2559, %v1662_v35   ;;  %v1152_v15 = vsub.f32 0.0, %v1088_v34  ;;  %v1089_v7 = vand.u32 2147483647, %v4170_v41  ;;  %v1699_v8 = vadd.f32 1.0, %v1635_v10  ;;  %v914_v31 = vpop.xlane.xlu1 %913 }
 0x1f2   :  { %v4181_v38 = vpop.eup %2748  ;;  %v1572_v13 = vmul.f32 %v2747_v25, %v4108_v20  ;;  %v1104_v29 = vand.u32 2147483647, %v4179_v17  ;;  %v1151_v60 = vsub.f32 0.0, %v1087_v48  ;;  %2758 = vpow2.f32 %v1322_v24 }
 0x1f3   :  { %v1324_v0 = vmul.f32 1.442695, %v1197_v42  ;;  %v1320_v45 = vmul.f32 1.442695, %v1195_v11  ;;  %2760 = vrcp.f32 %v1384_v61  ;;  %v1385_v20 = vadd.f32 1.0, %v4181_v38 }
 0x1f4   :  { %v1168_v28 = vsub.f32 0.0, %v1104_v29  ;;  %v4195_v50 = vadd.f32 %v4113_v49, %v905_v4  ;;  %v1636_v27 = vsel %vm1508_vm10, %v2747_v25, %v1572_v13  ;;  %v1090_v48 = vand.u32 2147483647, %v4187_v44 }
 0x1f5   :  { %v2751_v6 = vpop.eup %2750  ;;  %1972 = vperm.xlu0 %2560, %v1698_v58   ;;  %2762 = vpow2.f32 %v1320_v45  ;;  %v1234_v10 = vmul.f32 1.442695, %v1152_v15  ;;  %vm1509_vm11 = vcmp.ge.f32.partialorder %v4048_v37, 0.0  ;;  %v1153_v42 = vsub.f32 0.0, %v1089_v7  ;;  %v4210_v37 = vpop.xlane.xlu0 %898 }
 0x1f6   :  { %v4197_v34 = vpop.eup %2752  ;;  %v1573_v21 = vmul.f32 %v2751_v6, %v4120_v18  ;;  %v1266_v24 = vmul.f32 1.442695, %v1168_v28  ;;  %v1232_v4 = vmul.f32 1.442695, %v1151_v60  ;;  %2764 = vpow2.f32 %v1324_v0  ;;  %v908_v60 = vpop.xlane.xlu1 %907 }
 0x1f7   :  { %v4205_v55 = vadd.f32 %v4113_v49, %v914_v31  ;;  %v1700_v59 = vadd.f32 1.0, %v1636_v27  ;;  %2766 = vrcp.f32 %v1385_v20  ;;  %v1386_v18 = vadd.f32 1.0, %v4197_v34 }
 0x1f8   :  { %v1102_v25 = vand.u32 2147483647, %v4195_v50  ;;  %v1637_v61 = vsel %vm1509_vm11, %v2751_v6, %v1573_v21  ;;  %v1154_v11 = vsub.f32 0.0, %v1090_v48  ;;  %2768 = vpow2.f32 %v1266_v24 }
 0x1f9   :  { %v2755_v35 = vpop.eup %2754  ;;  %1977 = vperm.xlu0 %2560, %v1699_v8   ;;  %2770 = vpow2.f32 %v1234_v10  ;;  %v1236_v7 = vmul.f32 1.442695, %v1153_v42  ;;  %v1105_v29 = vand.u32 2147483647, %v4205_v55  ;;  %v1701_v0 = vadd.f32 1.0, %v1637_v61 }
 0x1fa   :  { %v1574_v13 = vmul.f32 %v2755_v35, %v4131_v26  ;;  %v1166_v15 = vsub.f32 0.0, %v1102_v25  ;;  %vm1510_vm12 = vcmp.ge.f32.partialorder %v4061_v16, 0.0  ;;  %2772 = vrcp.f32 %v1386_v18  ;;  %v4221_v16 = vpop.xlane.xlu0 %892 }
 0x1fb   :  { %v2757_v58 = vpop.eup %2756  ;;  %2774 = vpow2.f32 %v1232_v4  ;;  %v1238_v20 = vmul.f32 1.442695, %v1154_v11  ;;  %v1169_v28 = vsub.f32 0.0, %v1105_v29  ;;  %vm1511_vm13 = vcmp.ge.f32.partialorder %v4078_v22, 0.0 }
 0x1fc   :  { %v1575_v8 = vmul.f32 %v2757_v58, %v4135_v43  ;;  %v1262_v6 = vmul.f32 1.442695, %v1166_v15  ;;  %v4215_v45 = vpop.eup %2758  ;;  %v1638_v26 = vsel %vm1510_vm12, %v2755_v35, %v1574_v13  ;;  %v4219_v43 = vadd.f32 %v4113_v49, %v908_v60 }
 0x1fd   :  { %1982 = vperm.xlu0 %2560, %v1700_v59   ;;  %v2761_v31 = vpop.eup %2760  ;;  %v1268_v48 = vmul.f32 1.442695, %v1169_v28  ;;  %v1702_v10 = vadd.f32 1.0, %v1638_v26  ;;  %v1388_v24 = vadd.f32 1.0, %v4215_v45  ;;  %v4230_v59 = vadd.f32 %v4113_v49, %v4106_v63 }
 0x1fe   :  { %2776 = vpow2.f32 %v1262_v6  ;;  %v1639_v21 = vsel %vm1511_vm13, %v2757_v58, %v1575_v8  ;;  %v1103_v42 = vand.u32 2147483647, %v4219_v43  ;;  %v1576_v22 = vmul.f32 %v2761_v31, %v4165_v51  ;;  %v4245_v29 = vpop.xlane.xlu0 %901 }
 0x1ff   :  { %v2763_v27 = vpop.eup %2762  ;;  %2778 = vpow2.f32 %v1236_v7  ;;  %v1703_v58 = vadd.f32 1.0, %v1639_v21  ;;  %v4236_v13 = vadd.f32 %v4113_v49, %v4054_v12  ;;  %vm1512_vm14 = vcmp.ge.f32.partialorder %v4087_v39, 0.0 }
 0x200   :  { %v1387_v35 = vadd.f32 1.0, %v2763_v27  ;;  %v4225_v4 = vpop.eup %2764  ;;  %2780 = vpow2.f32 %v1238_v20  ;;  %v1167_v25 = vsub.f32 0.0, %v1103_v42  ;;  %v1640_v15 = vsel %vm1512_vm14, %v2761_v31, %v1576_v22 }
 0x201   :  { %1987 = vperm.xlu0 %2560, %v1701_v0   ;;  %v2767_v18 = vpop.eup %2766  ;;  %v1389_v51 = vadd.f32 1.0, %v4225_v4  ;;  %v1091_v8 = vand.u32 2147483647, %v4230_v59  ;;  %v1092_v39 = vand.u32 2147483647, %v4236_v13  ;;  %v1704_v26 = vadd.f32 1.0, %v1640_v15 }
 0x202   :  { %2782 = vrcp.f32 %v1387_v35  ;;  %v4232_v61 = vpop.eup %2768  ;;  %v1577_v7 = vmul.f32 %v2767_v18, %v4181_v38  ;;  %v1264_v60 = vmul.f32 1.442695, %v1167_v25  ;;  %vm1513_vm15 = vcmp.ge.f32.partialorder %v4102_v30, 0.0  ;;  %v4264_v30 = vpop.xlane.xlu0 %895 }
 0x203   :  { %2784 = vpow2.f32 %v1268_v48  ;;  %v1360_v63 = vadd.f32 1.0, %v4232_v61  ;;  %v4241_v11 = vpop.eup %2770  ;;  %v4255_v38 = vadd.f32 %v4113_v49, %v4094_v3  ;;  %v1155_v31 = vsub.f32 0.0, %v1091_v8 }
 0x204   :  { %2786 = vrcp.f32 %v1388_v24  ;;  %v2773_v12 = vpop.eup %2772  ;;  %v1641_v28 = vsel %vm1513_vm15, %v2767_v18, %v1577_v7  ;;  %v1156_v35 = vsub.f32 0.0, %v1092_v39  ;;  %vm1514_vm0 = vcmp.ge.f32.partialorder %v4116_v14, 0.0 }
 0x205   :  { %1992 = vperm.xlu0 %2560, %v1702_v10   ;;  %2788 = vrcp.f32 %v1360_v63  ;;  %v4247_v0 = vpop.eup %2774  ;;  %v1578_v21 = vmul.f32 %v2773_v12, %v4197_v34  ;;  %v1705_v42 = vadd.f32 1.0, %v1641_v28  ;;  %v1093_v22 = vand.u32 2147483647, %v4255_v38 }
 0x206   :  { %2790 = vpow2.f32 %v1264_v60  ;;  %v1343_v24 = vadd.f32 1.0, %v4247_v0  ;;  %v1240_v34 = vmul.f32 1.442695, %v1155_v31  ;;  %v4272_v25 = vadd.f32 %v4113_v49, %v4137_v5 }
 0x207   :  { %2792 = vrcp.f32 %v1389_v51  ;;  %vm1515_vm3 = vcmp.ge.f32.partialorder %v4161_v1, 0.0  ;;  %v1242_v7 = vmul.f32 1.442695, %v1156_v35  ;;  %v4278_v14 = vadd.f32 %v4113_v49, %v4191_v47 }
 0x208   :  { %v4250_v6 = vpop.eup %2776  ;;  %v1344_v5 = vadd.f32 1.0, %v4241_v11  ;;  %v1157_v39 = vsub.f32 0.0, %v1093_v22  ;;  %v1094_v31 = vand.u32 2147483647, %v4272_v25  ;;  %vm1488_vm4 = vcmp.ge.f32.partialorder %v4179_v17, 0.0 }
 0x209   :  { %1997 = vperm.xlu0 %2560, %v1703_v58   ;;  %v4257_v20 = vpop.eup %2778  ;;  %v1358_v48 = vadd.f32 1.0, %v4250_v6  ;;  %v1642_v58 = vsel %vm1514_vm0, %v2773_v12, %v1578_v21  ;;  %vm1516_vm5 = vcmp.ge.f32.partialorder %v4127_v36, 0.0  ;;  %v4303_v36 = vadd.f32 %v4113_v49, %v4172_v56 }
 0x20a   :  { %v4261_v10 = vpop.eup %2780  ;;  %vm1486_vm6 = vcmp.ge.f32.partialorder %v4195_v50, 0.0  ;;  %vm1517_vm7 = vcmp.ge.f32.partialorder %v4140_v62, 0.0  ;;  %vm1489_vm8 = vcmp.ge.f32.partialorder %v4205_v55, 0.0  ;;  %vm1487_vm9 = vcmp.ge.f32.partialorder %v4219_v43, 0.0 }
 0x20b   :  { %2794 = vrcp.f32 %v1358_v48  ;;  %v4290_v48 = vadd.f32 %v4113_v49, %v4122_v2  ;;  %v1244_v2 = vmul.f32 1.442695, %v1157_v39  ;;  %vm1471_vm10 = vcmp.ge.f32.partialorder %v4151_v54, 0.0 }
 0x20c   :  { %v2783_v3 = vpop.eup %2782  ;;  %2796 = vrcp.f32 %v1343_v24  ;;  %vm1472_vm11 = vcmp.ge.f32.partialorder %v4146_v19, 0.0  ;;  %vm1473_vm12 = vcmp.ge.f32.partialorder %v4170_v41, 0.0  ;;  %vm1474_vm13 = vcmp.ge.f32.partialorder %v4187_v44, 0.0 }
 0x20d   :  { %2002 = vperm.xlu0 %2560, %v1704_v26   ;;  %v4268_v18 = vpop.eup %2784  ;;  %v1579_v51 = vmul.f32 %v2783_v3, %v2763_v27  ;;  %v1706_v27 = vadd.f32 1.0, %v1642_v58  ;;  %vm1475_vm14 = vcmp.ge.f32.partialorder %v4230_v59, 0.0  ;;  %vm1476_vm15 = vcmp.ge.f32.partialorder %v4236_v13, 0.0 }
 0x20e   :  { %v2787_v63 = vpop.eup %2786  ;;  %v1361_v15 = vadd.f32 1.0, %v4268_v18  ;;  %vm1477_vm0 = vcmp.ge.f32.partialorder %v4255_v38, 0.0 }
 0x20f   :  { %v1643_v8 = vsel %vm1515_vm3, %v2783_v3, %v1579_v51  ;;  %v2789_v12 = vpop.eup %2788  ;;  %v1580_v28 = vmul.f32 %v2787_v63, %v4215_v45  ;;  %v1345_v3 = vadd.f32 1.0, %v4257_v20  ;;  %v1095_v45 = vand.u32 2147483647, %v4278_v14 }
 0x210   :  { %2798 = vrcp.f32 %v1361_v15  ;;  %v4283_v1 = vpop.eup %2790  ;;  %v1552_v21 = vmul.f32 %v2789_v12, %v4232_v61  ;;  %v1707_v24 = vadd.f32 1.0, %v1643_v8  ;;  %v1158_v51 = vsub.f32 0.0, %v1094_v31 }
 0x211   :  { %2007 = vperm.xlu0 %2560, %v1705_v42   ;;  %2800 = vpow2.f32 %v1240_v34  ;;  %v2793_v47 = vpop.eup %2792  ;;  %v1359_v35 = vadd.f32 1.0, %v4283_v1  ;;  %v1644_v58 = vsel %vm1516_vm5, %v2787_v63, %v1580_v28  ;;  %v1346_v8 = vadd.f32 1.0, %v4261_v10 }
 0x212   :  { %2802 = vpow2.f32 %v1242_v7  ;;  %v1616_v42 = vsel %vm1488_vm4, %v2789_v12, %v1552_v21  ;;  %v1581_v17 = vmul.f32 %v2793_v47, %v4225_v4  ;;  %v1096_v7 = vand.u32 2147483647, %v4290_v48 }
 0x213   :  { %2804 = vrcp.f32 %v1359_v35  ;;  %v1680_v61 = vadd.f32 1.0, %v1616_v42  ;;  %v1159_v12 = vsub.f32 0.0, %v1095_v45  ;;  %v1708_v63 = vadd.f32 1.0, %v1644_v58 }
 0x214   :  { %2806 = vrcp.f32 %v1344_v5  ;;  %v4872_v5 = vmax.f32 %v3084_v46, 0.0  ;;  %v1645_v31 = vsel %vm1517_vm7, %v2793_v47, %v1581_v17  ;;  %v1160_v56 = vsub.f32 0.0, %v1096_v7 }
 0x215   :  { %2012 = vperm.xlu0 %2560, %v1706_v27   ;;  %v2795_v34 = vpop.eup %2794  ;;  %1882 = vperm.xlu1 %2559, %v1680_v61   ;;  %2808 = vrcp.f32 %v1345_v3  ;;  %v4873_v3 = vmax.f32 %v3075_v40, 0.0  ;;  %v4874_v45 = vmax.f32 %v3102_v57, 0.0  ;;  %v1097_v46 = vand.u32 2147483647, %v4303_v36 }
 0x216   :  { %v1550_v27 = vmul.f32 %v2795_v34, %v4250_v6  ;;  %v2797_v28 = vpop.eup %2796  ;;  %2810 = vpow2.f32 %v1244_v2  ;;  %v1246_v6 = vmul.f32 1.442695, %v1158_v51  ;;  %v1248_v61 = vmul.f32 1.442695, %v1159_v12 }
 0x217   :  { %2812 = vrcp.f32 %v1346_v8  ;;  %v4875_v58 = vmax.f32 %v3097_v53, 0.0  ;;  %v4326_v51 = vadd.f32 %v4113_v49, %v4221_v16  ;;  %v1535_v53 = vmul.f32 %v2797_v28, %v4247_v0 }
 0x218   :  { %v1614_v4 = vsel %vm1486_vm6, %v2795_v34, %v1550_v27  ;;  %v1709_v34 = vadd.f32 1.0, %v1645_v31  ;;  %2814 = vpow2.f32 %v1246_v6  ;;  %v1161_v16 = vsub.f32 0.0, %v1097_v46 }
 0x219   :  { %2017 = vperm.xlu0 %2560, %v1707_v24   ;;  %v1678_v21 = vadd.f32 1.0, %v1614_v4  ;;  %2816 = vpow2.f32 %v1248_v61  ;;  %v1098_v6 = vand.u32 2147483647, %v4326_v51  ;;  %v4339_v0 = vadd.f32 %v4113_v49, %v4264_v30 }
 0x21a   :  { %v2799_v35 = vpop.eup %2798  ;;  %vm1478_vm3 = vcmp.ge.f32.partialorder %v4272_v25, 0.0  ;;  %vm1479_vm4 = vcmp.ge.f32.partialorder %v4278_v14, 0.0  ;;  %vm1480_vm5 = vcmp.ge.f32.partialorder %v4290_v48, 0.0  ;;  %vm1481_vm6 = vcmp.ge.f32.partialorder %v4303_v36, 0.0 }
 0x21b   :  { %v4313_v42 = vpop.eup %2800  ;;  %v1553_v47 = vmul.f32 %v2799_v35, %v4268_v18  ;;  %1872 = vperm.xlu1 %2559, %v1678_v21   ;;  %v1162_v54 = vsub.f32 0.0, %v1098_v6  ;;  %v1099_v30 = vand.u32 2147483647, %v4339_v0  ;;  %v4878_v6 = vmax.f32 %v3174_v52, 0.0 }
 0x21c   :  { %v4322_v57 = vpop.eup %2802  ;;  %v1347_v18 = vadd.f32 1.0, %v4313_v42  ;;  %vm1482_vm7 = vcmp.ge.f32.partialorder %v4326_v51, 0.0 }
 0x21d   :  { %v1723_v26 = vpop.permute.xlu1 %1722  ;;  %2022 = vperm.xlu0 %2560, %v1708_v63   ;;  %v1617_v17 = vsel %vm1489_vm8, %v2799_v35, %v1553_v47  ;;  %v1348_v21 = vadd.f32 1.0, %v4322_v57  ;;  %vm1483_vm8 = vcmp.ge.f32.partialorder %v4339_v0, 0.0  ;;  %v2239_v0 = vld [vmem:[%s4695_s5 + $0x10] sm:$0xff] }
 0x21e   :  { %v2032_v50 = vmul.f32 %v1723_v26, %v4873_v3  ;;  %v1681_v8 = vadd.f32 1.0, %v1617_v17  ;;  %2818 = vrcp.f32 %v1347_v18 }
 0x220   :  { %v2097_v7 = vsel %vm806_vm2, %v2032_v50, 0.0  ;;  %1887 = vperm.xlu1 %2559, %v1681_v8   ;;  %v1252_v50 = vmul.f32 1.442695, %v1161_v16 }
 0x221   :  { %v4280_v60 = vpop.permute.xlu0 %1902  ;;  %2027 = vperm.xlu0 %2560, %v1709_v34  }
 0x225   :  { %v1713_v15 = vpop.permute.xlu0 %1712 }
 0x226   :  { %v2030_v39 = vmul.f32 %v1713_v15, %v4872_v5  ;;  %v2805_v15 = vpop.eup %2804 }
 0x227   :  { %v1551_v27 = vmul.f32 %v2805_v15, %v4283_v1  ;;  %v2807_v4 = vpop.eup %2806 }
 0x228   :  { %v1728_v22 = vpop.permute.xlu1 %1727  ;;  %v2094_v2 = vsel %vm806_vm2, %v2030_v39, 0.0  ;;  %v2809_v39 = vpop.eup %2808  ;;  %v1536_v43 = vmul.f32 %v2807_v4, %v4241_v11  ;;  %v4876_v11 = vmax.f32 %v3146_v23, 0.0  ;;  %v1163_v23 = vsub.f32 0.0, %v1099_v30 }
 0x229   :  { %v2033_v40 = vmul.f32 %v1728_v22, %v4875_v58  ;;  %v1250_v22 = vmul.f32 1.442695, %v1160_v56  ;;  %v1615_v31 = vsel %vm1487_vm9, %v2805_v15, %v1551_v27  ;;  %v4343_v35 = vpop.eup %2810  ;;  %v1599_v56 = vsel %vm1471_vm10, %v2797_v28, %v1535_v53 }
 0x22a   :  { %v2813_v3 = vpop.eup %2812  ;;  %v1663_v46 = vadd.f32 1.0, %v1599_v56  ;;  %v1349_v61 = vadd.f32 1.0, %v4343_v35  ;;  %v1600_v34 = vsel %vm1472_vm11, %v2807_v4, %v1536_v43  ;;  %v1254_v58 = vmul.f32 1.442695, %v1162_v54 }
 0x22b   :  { %v2099_v5 = vsel %vm806_vm2, %v2033_v40, 0.0  ;;  %2820 = vpow2.f32 %v1250_v22  ;;  %v4355_v47 = vpop.eup %2814  ;;  %v4363_v40 = vadd.f32 %v4113_v49, %v4245_v29  ;;  %v1256_v29 = vmul.f32 1.442695, %v1163_v23 }
 0x22c   :  { %2822 = vrcp.f32 %v1348_v21  ;;  %v4365_v17 = vpop.eup %2816  ;;  %v1350_v41 = vadd.f32 1.0, %v4355_v47  ;;  %v4879_v43 = vmax.f32 %v3161_v32, 0.0  ;;  %vm2883_vm11 = vmmov 0  }
 0x22d   :  { %v1718_v24 = vpop.permute.xlu1 %1717  ;;  %2824 = vpow2.f32 %v1252_v50  ;;  %v2819_v8 = vpop.eup %2818  ;;  %v1351_v27 = vadd.f32 1.0, %v4365_v17  ;;  %vm1485_vm10 = vcmp.ge.f32.partialorder %v4363_v40, 0.0 }
 0x22e   :  { %v2031_v62 = vmul.f32 %v1718_v24, %v4874_v45  ;;  %v1679_v24 = vadd.f32 1.0, %v1615_v31  ;;  %v4348_v45 = vadd.f32 %v4113_v49, %v4210_v37  ;;  %v1537_v37 = vmul.f32 %v2809_v39, %v4257_v20 }
 0x22f   :  { %v1538_v20 = vmul.f32 %v2813_v3, %v4261_v10  ;;  %2826 = vrcp.f32 %v1349_v61  ;;  %v1101_v49 = vand.u32 2147483647, %v4363_v40 }
 0x230   :  { %v2095_v26 = vsel %vm806_vm2, %v2031_v62, 0.0  ;;  %1877 = vperm.xlu1 %2559, %v1679_v24   ;;  %v1100_v19 = vand.u32 2147483647, %v4348_v45  ;;  %v1601_v18 = vsel %vm1473_vm12, %v2809_v39, %v1537_v37  ;;  %2828 = vpow2.f32 %v1254_v58 }
 0x231   :  { %v2096_v55 = vadd.f32 %v2095_v26, %v2094_v2  ;;  %v4332_v63 = vpop.permute.xlu1 %1742  ;;  %v1665_v53 = vadd.f32 1.0, %v1601_v18  ;;  %v1602_v22 = vsel %vm1474_vm13, %v2813_v3, %v1538_v20  ;;  %2830 = vrcp.f32 %v1350_v41 }
 0x232   :  { %v4877_v39 = vmax.f32 %v3129_v9, 0.0  ;;  %v1165_v21 = vsub.f32 0.0, %v1101_v49  ;;  %2832 = vpow2.f32 %v1256_v29  ;;  %v4404_v29 = vpop.permute.xlu0 %1892  ;;  %vm1484_vm9 = vcmp.ge.f32.partialorder %v4348_v45, 0.0 }
 0x233   :  { %v2098_v12 = vadd.f32 %v2097_v7, %v2096_v55  ;;  %v1664_v55 = vadd.f32 1.0, %v1600_v34  ;;  %v1164_v7 = vsub.f32 0.0, %v1100_v19  ;;  %2834 = vrcp.f32 %v1351_v27 }
 0x234   :  { %1797 = vperm.xlu1 %2559, %v1663_v46   ;;  %v2036_v44 = vmul.f32 %v4332_v63, %v4877_v39  ;;  %v1260_v54 = vmul.f32 1.442695, %v1165_v21  ;;  %vm2235_vm12 = vcmask 1040384  }
 0x235   :  { %v2100_v1 = vadd.f32 %v2099_v5, %v2098_v12  ;;  %v4372_v10 = vpop.eup %2820  ;;  %v1539_v12 = vmul.f32 %v2819_v8, %v4313_v42  ;;  %v1258_v5 = vmul.f32 1.442695, %v1164_v7 }
 0x236   :  { %v2823_v16 = vpop.eup %2822  ;;  %v1352_v42 = vadd.f32 1.0, %v4372_v10  ;;  %v2105_v59 = vsel %vm806_vm2, %v2036_v44, 0.0  ;;  %v4415_v21 = vpop.permute.xlu0 %1907 }
 0x237   :  { %v1733_v62 = vpop.permute.xlu1 %1732  ;;  %v4381_v24 = vpop.eup %2824  ;;  %v1540_v63 = vmul.f32 %v2823_v16, %v4322_v57  ;;  %v1603_v3 = vsel %vm1475_vm14, %v2819_v8, %v1539_v12  ;;  %2836 = vpow2.f32 %v1258_v5  ;;  %v4880_v8 = vmax.f32 %v3224_v33, 0.0  ;;  %v4881_v5 = vld [vmem:[#allocation15_spill] sm:$0xff] }
 0x238   :  { %v2034_v28 = vmul.f32 %v1733_v62, %v4876_v11  ;;  %1802 = vperm.xlu1 %2559, %v1664_v55   ;;  %v1667_v46 = vadd.f32 1.0, %v1603_v3  ;;  %2838 = vrcp.f32 %v1352_v42  ;;  %v1353_v32 = vadd.f32 1.0, %v4381_v24 }
 0x239   :  { %v2827_v50 = vpop.eup %2826  ;;  %v1604_v57 = vsel %vm1476_vm15, %v2823_v16, %v1540_v63  ;;  %2840 = vpow2.f32 %v1260_v54  ;;  %v4882_v39 = vmax.f32 %v4881_v5, 0.0 }
 0x23a   :  { %v2101_v2 = vsel %vm806_vm2, %v2034_v28, 0.0  ;;  %v2829_v11 = vpop.eup %2828  ;;  %v1541_v28 = vmul.f32 %v2827_v50, %v4343_v35  ;;  %v1668_v19 = vadd.f32 1.0, %v1604_v57  ;;  %2842 = vrcp.f32 %v1353_v32 }
 0x23b   :  { %v2102_v26 = vadd.f32 %v2101_v2, %v2100_v1  ;;  %v1748_v15 = vpop.permute.xlu1 %1747  ;;  %v1666_v1 = vadd.f32 1.0, %v1602_v22  ;;  %v2831_v37 = vpop.eup %2830  ;;  %v1354_v13 = vadd.f32 1.0, %v2829_v11 }
 0x23c   :  { %1807 = vperm.xlu1 %2559, %v1665_v53   ;;  %v2037_v56 = vmul.f32 %v1748_v15, %v4879_v43  ;;  %v4394_v2 = vpop.eup %2832  ;;  %v1605_v58 = vsel %vm1477_vm0, %v2827_v50, %v1541_v28  ;;  %v1542_v23 = vmul.f32 %v2831_v37, %v4355_v47 }
 0x23d   :  { %v2835_v55 = vpop.eup %2834  ;;  %v1669_v41 = vadd.f32 1.0, %v1605_v58  ;;  %2844 = vrcp.f32 %v1354_v13  ;;  %v1355_v35 = vadd.f32 1.0, %v4394_v2 }
 0x23e   :  { %v2107_v61 = vsel %vm806_vm2, %v2037_v56, 0.0  ;;  %v1606_v15 = vsel %vm1478_vm3, %v2831_v37, %v1542_v23  ;;  %v1543_v38 = vmul.f32 %v2835_v55, %v4365_v17 }
 0x23f   :  { %v1738_v4 = vpop.permute.xlu1 %1737  ;;  %v1670_v53 = vadd.f32 1.0, %v1606_v15  ;;  %2846 = vrcp.f32 %v1355_v35 }
 0x240   :  { %v2035_v31 = vmul.f32 %v1738_v4, %v4878_v6  ;;  %1812 = vperm.xlu1 %2559, %v1666_v1   ;;  %v1607_v27 = vsel %vm1479_vm4, %v2835_v55, %v1543_v38  ;;  %v4883_v6 = vld [vmem:[#allocation19_spill] sm:$0xff]  ;;  %v2240_v55 = vld [vmem:[%s4695_s5 + $0x18] sm:$0xff]  ;;  %v2884_v38 = vmov 0.0  }
 0x241   :  { %v2837_v20 = vpop.eup %2836  ;;  %v1671_v4 = vadd.f32 1.0, %v1607_v27  ;;  %v4884_v14 = vmax.f32 %v4883_v6, 0.0  ;;  %2537 = vmatprep.mubr.msk.f32.mxu1 %vm2883_vm11, %v2884_v38  ;;  %v4885_v6 = vld [vmem:[#allocation56_spill] sm:$0xff] }
 0x242   :  { %v2103_v9 = vsel %vm806_vm2, %v2035_v31, 0.0  ;;  %v2839_v18 = vpop.eup %2838  ;;  %v1356_v47 = vadd.f32 1.0, %v2837_v20 }
 0x243   :  { %v2104_v52 = vadd.f32 %v2103_v9, %v2102_v26  ;;  %v1763_v62 = vpop.permute.xlu1 %1762  ;;  %v2841_v25 = vpop.eup %2840  ;;  %v1544_v22 = vmul.f32 %v2839_v18, %v4372_v10 }
 0x244   :  { %1817 = vperm.xlu1 %2559, %v1667_v46   ;;  %v2843_v12 = vpop.eup %2842  ;;  %2848 = vrcp.f32 %v1356_v47  ;;  %v1357_v16 = vadd.f32 1.0, %v2841_v25  ;;  %v2040_v44 = vmul.f32 %v1763_v62, %v4882_v39  ;;  %v4428_v62 = vpop.permute.xlu0 %1897 }
 0x245   :  { %v2106_v30 = vadd.f32 %v2105_v59, %v2104_v52  ;;  %v1608_v1 = vsel %vm1480_vm5, %v2839_v18, %v1544_v22  ;;  %v1545_v10 = vmul.f32 %v2843_v12, %v4381_v24  ;;  %v2237_v24 = vld [vmem:[%s4695_s5] sm:$0xff]  ;;  %v2238_v59 = vld [vmem:[%s4695_s5 + $0x8] sm:$0xff] }
 0x246   :  { %v1672_v9 = vadd.f32 1.0, %v1608_v1  ;;  %2850 = vrcp.f32 %v1357_v16  ;;  %v2113_v63 = vsel %vm806_vm2, %v2040_v44, 0.0  ;;  %v2541_v36 = vpack.c.bf16 %v2238_v59, %v2237_v24 }
 0x247   :  { %v2108_v34 = vadd.f32 %v2107_v61, %v2106_v30  ;;  %v2845_v43 = vpop.eup %2844  ;;  %v1609_v3 = vsel %vm1481_vm6, %v2843_v12, %v1545_v10  ;;  %v2882_v30 = vmov 0.0|0.0   ;;  %v4887_v10 = vld [vmem:[#allocation53_spill] sm:$0xff] }
 0x248   :  { %v1753_v26 = vpop.permute.xlu1 %1752  ;;  %1822 = vperm.xlu1 %2559, %v1668_v19   ;;  %v1546_v52 = vmul.f32 %v2845_v43, %v2829_v11  ;;  %2540 = vmatprep.subr.bf16.mxu1 %v2882_v30  ;;  %v1673_v46 = vadd.f32 1.0, %v1609_v3  ;;  %v4433_v37 = vpop.permute.xlu0 %1922 }
 0x249   :  { %v2038_v7 = vmul.f32 %v1753_v26, %v4880_v8  ;;  %v2847_v54 = vpop.eup %2846  ;;  %2542 = vmatpush3.bf16.msra.mxu1 %v2541_v36 }
 0x24a   :  { %v1610_v61 = vsel %vm1482_vm7, %v2845_v43, %v1546_v52  ;;  %v1547_v11 = vmul.f32 %v2847_v54, %v4394_v2  ;;  %2543 = vmatprep.subr.bf16.mxu1 %v2882_v30  ;;  %v4891_v52 = vld [vmem:[#allocation58_spill] sm:$0xff] }
 0x24b   :  { %v2109_v17 = vsel %vm806_vm2, %v2038_v7, 0.0  ;;  %v1674_v57 = vadd.f32 1.0, %v1610_v61  ;;  %v4892_v24 = vmax.f32 %v4891_v52, 0.0  ;;  %v4907_v52 = vld [vmem:[#allocation23_spill] sm:$0xff] }
 0x24c   :  { %1827 = vperm.xlu1 %2559, %v1669_v41   ;;  %v2110_v42 = vadd.f32 %v2109_v17, %v2108_v34  ;;  %v1611_v34 = vsel %vm1483_vm8, %v2847_v54, %v1547_v11  ;;  %v1913_v23 = vpop.permute.xlu0 %1912 }
 0x24d   :  { %v4402_v49 = vpop.permute.xlu1 %1767  ;;  %v1675_v13 = vadd.f32 1.0, %v1611_v34 }
 0x24e   :  { %v2849_v32 = vpop.eup %2848 }
 0x24f   :  { %v1548_v28 = vmul.f32 %v2849_v32, %v2837_v20  ;;  %v2544_v20 = vpack.c.bf16 %v2240_v55, %v2239_v0 }
 0x250   :  { %1832 = vperm.xlu1 %2559, %v1670_v53   ;;  %v2851_v19 = vpop.eup %2850  ;;  %v4443_v41 = vpop.permute.xlu0 %1927 }
 0x251   :  { %v1612_v51 = vsel %vm1484_vm9, %v2849_v32, %v1548_v28  ;;  %v1549_v58 = vmul.f32 %v2851_v19, %v2841_v25  ;;  %2545 = vmatpush3.bf16.msra.mxu1 %v2544_v20  ;;  %v4895_v28 = vld [vmem:[#allocation9_spill] sm:$0xff] }
 0x252   :  { %v1758_v33 = vpop.permute.xlu1 %1757  ;;  %v1676_v26 = vadd.f32 1.0, %v1612_v51  ;;  %v4896_v34 = vmax.f32 %v4895_v28, 0.0 }
 0x253   :  { %v2039_v31 = vmul.f32 %v1758_v33, %v4884_v14  ;;  %v1613_v2 = vsel %vm1485_vm10, %v2851_v19, %v1549_v58  ;;  %v4886_v14 = vmax.f32 %v4885_v6, 0.0 }
 0x254   :  { %1837 = vperm.xlu1 %2559, %v1671_v4   ;;  %v1677_v45 = vadd.f32 1.0, %v1613_v2  ;;  %v1918_v35 = vpop.permute.xlu0 %1917  ;;  %v2067_v19 = vmul.f32 %v4428_v62, %v4896_v34  ;;  %v4897_v2 = vld [vmem:[#allocation6_spill] sm:$0xff] }
 0x255   :  { %v2111_v48 = vsel %vm806_vm2, %v2039_v31, 0.0  ;;  %v4898_v0 = vmax.f32 %v4897_v2, 0.0 }
 0x256   :  { %v2112_v56 = vadd.f32 %v2111_v48, %v2110_v42  ;;  %v4888_v42 = vmax.f32 %v4887_v10, 0.0  ;;  %v4889_v48 = vld [vmem:[#allocation60_spill] sm:$0xff] }
 0x257   :  { %v2068_v55 = vmul.f32 %v4280_v60, %v4898_v0 }
 0x258   :  { %v4420_v50 = vadd.f32 %v2113_v63, %v2112_v56  ;;  %1842 = vperm.xlu1 %2559, %v1672_v9   ;;  %v4445_v15 = vpop.permute.xlu0 %1942  ;;  %v4890_v56 = vmax.f32 %v4889_v48, 0.0 }
 0x259   :  { %v4451_v8 = vpop.permute.xlu1 %1782  ;;  %v2176_v6 = vsel %vm806_vm2, %v2068_v55, 0.0 }
 0x25c   :  { %1847 = vperm.xlu1 %2559, %v1673_v46   ;;  %v4447_v40 = vpop.permute.xlu0 %1932  ;;  %v4893_v46 = vld [vmem:[#allocation7_spill] sm:$0xff] }
 0x25d   :  { %v1773_v47 = vpop.permute.xlu1 %1772  ;;  %v4894_v32 = vmax.f32 %v4893_v46, 0.0  ;;  %v4909_v46 = vld [vmem:[#allocation10_spill] sm:$0xff] }
 0x25f   :  { %v2066_v61 = vmul.f32 %v4404_v29, %v4894_v32  ;;  %v4910_v32 = vmax.f32 %v4909_v46, 0.0 }
 0x260   :  { %1852 = vperm.xlu1 %2559, %v1674_v57   ;;  %v4449_v18 = vpop.permute.xlu0 %1947 }
 0x261   :  { %v4457_v25 = vpop.permute.xlu1 %1787  ;;  %v2172_v20 = vsel %vm806_vm2, %v2066_v61, 0.0 }
 0x264   :  { %1857 = vperm.xlu1 %2559, %v1675_v13   ;;  %v4453_v7 = vpop.permute.xlu0 %1937 }
 0x268   :  { %1862 = vperm.xlu1 %2559, %v1676_v26   ;;  %v4455_v53 = vpop.permute.xlu0 %1952  ;;  %v1778_v27 = vpop.permute.xlu1 %1777 }
 0x26c   :  { %1867 = vperm.xlu1 %2559, %v1677_v45   ;;  %v4459_v22 = vpop.permute.xlu0 %1957  ;;  %v4899_v45 = vld [vmem:[#allocation8_spill] sm:$0xff] }
 0x26d   :  { %v4900_v38 = vmax.f32 %v4899_v45, 0.0 }
 0x270   :  { %v4461_v12 = vpop.permute.xlu0 %1962  ;;  %v4463_v17 = vpop.permute.xlu1 %1792 }
 0x274   :  { %v4465_v33 = vpop.permute.xlu0 %1967 }
 0x278   :  { %v4467_v16 = vpop.permute.xlu0 %1972 }
 0x27c   :  { %v4469_v39 = vpop.permute.xlu0 %1977 }
 0x280   :  { %v4477_v63 = vpop.permute.xlu0 %1982 }
 0x284   :  { %v4493_v51 = vpop.permute.xlu0 %1987 }
 0x288   :  { %v4506_v10 = vpop.permute.xlu0 %1992 }
 0x28c   :  { %v4529_v0 = vpop.permute.xlu0 %1997 }
 0x294   :  { %v1883_v4 = vpop.permute.xlu1 %1882 }
 0x295   :  { %v2064_v43 = vmul.f32 %v1883_v4, %v4888_v42  ;;  %v2069_v4 = vmul.f32 %v4415_v21, %v4900_v38 }
 0x297   :  { %v2168_v11 = vsel %vm806_vm2, %v2064_v43, 0.0  ;;  %v2178_v60 = vsel %vm806_vm2, %v2069_v4, 0.0  ;;  %v4903_v43 = vld [vmem:[#allocation13_spill] sm:$0xff] }
 0x298   :  { %v4904_v48 = vmax.f32 %v4903_v43, 0.0 }
 0x29a   :  { %v1873_v5 = vpop.permute.xlu1 %1872 }
 0x29b   :  { %v2062_v31 = vmul.f32 %v1873_v5, %v4886_v14  ;;  %v2174_v5 = vsel %vm806_vm2, %v2067_v19, 0.0  ;;  %v4901_v14 = vld [vmem:[#allocation11_spill] sm:$0xff] }
 0x29d   :  { %v2165_v3 = vsel %vm806_vm2, %v2062_v31, 0.0  ;;  %v4902_v31 = vmax.f32 %v4901_v14, 0.0  ;;  %v4919_v14 = vld [vmem:[#allocation20_spill] sm:$0xff] }
 0x29f   :  { %v1888_v44 = vpop.permute.xlu1 %1887 }
 0x2a0   :  { %v2065_v59 = vmul.f32 %v1888_v44, %v4892_v24  ;;  %v4908_v24 = vmax.f32 %v4907_v52, 0.0 }
 0x2a2   :  { %v2170_v13 = vsel %vm806_vm2, %v2065_v59, 0.0  ;;  %v2042_v59 = vmul.f32 %v1773_v47, %v4908_v24  ;;  %v4550_v24 = vpop.permute.xlu0 %2002 }
 0x2af   :  { %v1878_v1 = vpop.permute.xlu1 %1877 }
 0x2b0   :  { %v2063_v9 = vmul.f32 %v1878_v1, %v4890_v56  ;;  %v2070_v1 = vmul.f32 %v1913_v23, %v4902_v31  ;;  %v2071_v56 = vmul.f32 %v1918_v35, %v4904_v48  ;;  %v2072_v23 = vmul.f32 %v4433_v37, %v4910_v32  ;;  %v4913_v35 = vld [vmem:[#allocation12_spill] sm:$0xff]  ;;  %v4921_v48 = vld [vmem:[#allocation14_spill] sm:$0xff] }
 0x2b1   :  { %v4914_v19 = vmax.f32 %v4913_v35, 0.0  ;;  %v4920_v31 = vmax.f32 %v4919_v14, 0.0 }
 0x2b2   :  { %v2166_v54 = vsel %vm806_vm2, %v2063_v9, 0.0  ;;  %v4905_v9 = vld [vmem:[#allocation17_spill] sm:$0xff]  ;;  %v2180_v61 = vsel %vm806_vm2, %v2070_v1, 0.0 }
 0x2b3   :  { %v2167_v30 = vadd.f32 %v2166_v54, %v2165_v3  ;;  %v4483_v36 = vpop.permute.xlu1 %1797  ;;  %v4906_v3 = vmax.f32 %v4905_v9, 0.0  ;;  %v2075_v1 = vmul.f32 %v4453_v7, %v4920_v31  ;;  %v4939_v31 = vld [vmem:[#allocation33_spill] sm:$0xff] }
 0x2b5   :  { %v2169_v57 = vadd.f32 %v2168_v11, %v2167_v30  ;;  %v2041_v21 = vmul.f32 %v4402_v49, %v4906_v3  ;;  %v4911_v11 = vld [vmem:[#allocation27_spill] sm:$0xff]  ;;  %v2182_v49 = vsel %vm806_vm2, %v2071_v56, 0.0  ;;  %v4922_v56 = vmax.f32 %v4921_v48, 0.0  ;;  %v4923_v3 = vld [vmem:[#allocation18_spill] sm:$0xff] }
 0x2b6   :  { %v2190_v7 = vsel %vm806_vm2, %v2075_v1, 0.0  ;;  %v4941_v48 = vld [vmem:[#allocation26_spill] sm:$0xff] }
 0x2b7   :  { %v2171_v58 = vadd.f32 %v2170_v13, %v2169_v57  ;;  %v1803_v26 = vpop.permute.xlu1 %1802  ;;  %v4912_v57 = vmax.f32 %v4911_v11, 0.0  ;;  %v2073_v13 = vmul.f32 %v4443_v41, %v4914_v19  ;;  %v2115_v47 = vsel %vm806_vm2, %v2041_v21, 0.0 }
 0x2b8   :  { %v2116_v2 = vadd.f32 %v2115_v47, %v4420_v50  ;;  %v4924_v21 = vmax.f32 %v4923_v3, 0.0  ;;  %v4943_v3 = vld [vmem:[#allocation39_spill] sm:$0xff] }
 0x2b9   :  { %v2173_v29 = vadd.f32 %v2172_v20, %v2171_v58  ;;  %v2043_v28 = vmul.f32 %v1778_v27, %v4912_v57  ;;  %v2117_v58 = vsel %vm806_vm2, %v2042_v59, 0.0  ;;  %v2184_v20 = vsel %vm806_vm2, %v2072_v23, 0.0  ;;  %v4915_v27 = vld [vmem:[#allocation16_spill] sm:$0xff]  ;;  %v4927_v23 = vld [vmem:[#allocation31_spill] sm:$0xff] }
 0x2ba   :  { %v2118_v38 = vadd.f32 %v2117_v58, %v2116_v2  ;;  %v2077_v52 = vmul.f32 %v4449_v18, %v4924_v21  ;;  %v4944_v21 = vmax.f32 %v4943_v3, 0.0 }
 0x2bb   :  { %v2175_v62 = vadd.f32 %v2174_v5, %v2173_v29  ;;  %v1808_v44 = vpop.permute.xlu1 %1807  ;;  %v4916_v29 = vmax.f32 %v4915_v27, 0.0  ;;  %v2119_v41 = vsel %vm806_vm2, %v2043_v28, 0.0  ;;  %v2186_v5 = vsel %vm806_vm2, %v2073_v13, 0.0  ;;  %v4931_v13 = vld [vmem:[#allocation35_spill] sm:$0xff] }
 0x2bc   :  { %v2194_v58 = vsel %vm806_vm2, %v2077_v52, 0.0 }
 0x2bd   :  { %v2177_v42 = vadd.f32 %v2176_v6, %v2175_v62  ;;  %v2074_v45 = vmul.f32 %v4447_v40, %v4916_v29  ;;  %v4917_v62 = vld [vmem:[#allocation22_spill] sm:$0xff]  ;;  %v2076_v40 = vmul.f32 %v4445_v15, %v4922_v56  ;;  %v4942_v56 = vmax.f32 %v4941_v48, 0.0 }
 0x2be   :  { %v4918_v6 = vmax.f32 %v4917_v62, 0.0  ;;  %v4935_v29 = vld [vmem:[#allocation30_spill] sm:$0xff]  ;;  %v4937_v62 = vld [vmem:[#allocation21_spill] sm:$0xff] }
 0x2bf   :  { %v2179_v54 = vadd.f32 %v2178_v60, %v2177_v42  ;;  %v1813_v30 = vpop.permute.xlu1 %1812  ;;  %v2120_v42 = vadd.f32 %v2119_v41, %v2118_v38  ;;  %v2188_v9 = vsel %vm806_vm2, %v2074_v45, 0.0  ;;  %v2192_v18 = vsel %vm806_vm2, %v2076_v40, 0.0 }
 0x2c0   :  { %v2044_v50 = vmul.f32 %v4451_v8, %v4918_v6  ;;  %v4936_v45 = vmax.f32 %v4935_v29, 0.0  ;;  %v4938_v6 = vmax.f32 %v4937_v62, 0.0  ;;  %v2081_v40 = vmul.f32 %v4465_v33, %v4942_v56  ;;  %v4963_v56 = vld [vmem:[#allocation52_spill] sm:$0xff] }
 0x2c1   :  { %v2181_v34 = vadd.f32 %v2180_v61, %v2179_v54  ;;  %v4925_v54 = vld [vmem:[#allocation25_spill] sm:$0xff]  ;;  %v4928_v61 = vmax.f32 %v4927_v23, 0.0  ;;  %v2050_v52 = vmul.f32 %v1813_v30, %v4944_v21  ;;  %v4947_v23 = vld [vmem:[#allocation44_spill] sm:$0xff] }
 0x2c2   :  { %v2121_v59 = vsel %vm806_vm2, %v2044_v50, 0.0  ;;  %v4926_v46 = vmax.f32 %v4925_v54, 0.0  ;;  %v2048_v41 = vmul.f32 %v1803_v26, %v4936_v45  ;;  %v2080_v50 = vmul.f32 %v4461_v12, %v4938_v6  ;;  %v4945_v54 = vld [vmem:[#allocation32_spill] sm:$0xff]  ;;  %v4959_v6 = vld [vmem:[#allocation47_spill] sm:$0xff] }
 0x2c3   :  { %v2183_v37 = vadd.f32 %v2182_v49, %v2181_v34  ;;  %v1818_v55 = vpop.permute.xlu1 %1817  ;;  %v2046_v15 = vmul.f32 %v4463_v17, %v4928_v61  ;;  %v2122_v11 = vadd.f32 %v2121_v59, %v2120_v42  ;;  %v4929_v34 = vld [vmem:[#allocation24_spill] sm:$0xff]  ;;  %v4932_v49 = vmax.f32 %v4931_v13, 0.0  ;;  %v4951_v13 = vld [vmem:[#allocation38_spill] sm:$0xff] }
 0x2c4   :  { %v2045_v32 = vmul.f32 %v4457_v25, %v4926_v46  ;;  %v4930_v35 = vmax.f32 %v4929_v34, 0.0  ;;  %v4948_v61 = vmax.f32 %v4947_v23, 0.0  ;;  %v4949_v30 = vld [vmem:[#allocation36_spill] sm:$0xff] }
 0x2c5   :  { %v2185_v4 = vadd.f32 %v2184_v20, %v2183_v37  ;;  %v2047_v47 = vmul.f32 %v4483_v36, %v4932_v49  ;;  %v4933_v37 = vld [vmem:[#allocation28_spill] sm:$0xff]  ;;  %v2125_v27 = vsel %vm806_vm2, %v2046_v15, 0.0  ;;  %v4950_v34 = vmax.f32 %v4949_v30, 0.0 }
 0x2c6   :  { %v2078_v19 = vmul.f32 %v4455_v53, %v4930_v35  ;;  %v2123_v2 = vsel %vm806_vm2, %v2045_v32, 0.0  ;;  %v4934_v17 = vmax.f32 %v4933_v37, 0.0  ;;  %v4575_v53 = vpop.permute.xlu0 %2007  ;;  %v2051_v15 = vmul.f32 %v1818_v55, %v4948_v61  ;;  %v4953_v55 = vld [vmem:[#allocation29_spill] sm:$0xff] }
 0x2c7   :  { %v2187_v60 = vadd.f32 %v2186_v5, %v2185_v4  ;;  %v1823_v43 = vpop.permute.xlu1 %1822  ;;  %v2124_v38 = vadd.f32 %v2123_v2, %v2122_v11  ;;  %v2127_v14 = vsel %vm806_vm2, %v2047_v47, 0.0  ;;  %v2083_v35 = vmul.f32 %v4469_v39, %v4950_v34  ;;  %v4969_v61 = vld [vmem:[#allocation37_spill] sm:$0xff] }
 0x2c8   :  { %v2079_v20 = vmul.f32 %v4459_v22, %v4934_v17  ;;  %v2196_v36 = vsel %vm806_vm2, %v2078_v19, 0.0  ;;  %v4940_v22 = vmax.f32 %v4939_v31, 0.0  ;;  %v2133_v19 = vsel %vm806_vm2, %v2050_v52, 0.0 }
 0x2c9   :  { %v2189_v8 = vadd.f32 %v2188_v9, %v2187_v60  ;;  %v2126_v42 = vadd.f32 %v2125_v27, %v2124_v38  ;;  %v2129_v9 = vsel %vm806_vm2, %v2048_v41, 0.0  ;;  %v4952_v49 = vmax.f32 %v4951_v13, 0.0  ;;  %v4955_v27 = vld [vmem:[#allocation41_spill] sm:$0xff]  ;;  %v4973_v13 = vld [vmem:[#allocation42_spill] sm:$0xff] }
 0x2ca   :  { %v2049_v1 = vmul.f32 %v1808_v44, %v4940_v22  ;;  %v2198_v26 = vsel %vm806_vm2, %v2079_v20, 0.0  ;;  %v4946_v44 = vmax.f32 %v4945_v54, 0.0  ;;  %v2013_v33 = vpop.permute.xlu0 %2012  ;;  %v4954_v37 = vmax.f32 %v4953_v55, 0.0 }
 0x2cb   :  { %v2191_v57 = vadd.f32 %v2190_v7, %v2189_v8  ;;  %v1828_v28 = vpop.permute.xlu1 %1827  ;;  %v2128_v12 = vadd.f32 %v2127_v14, %v2126_v42  ;;  %v2200_v7 = vsel %vm806_vm2, %v2080_v50, 0.0  ;;  %v2052_v47 = vmul.f32 %v1823_v43, %v4952_v49 }
 0x2cc   :  { %v2082_v46 = vmul.f32 %v4467_v16, %v4946_v44  ;;  %v2131_v32 = vsel %vm806_vm2, %v2049_v1, 0.0  ;;  %v2084_v17 = vmul.f32 %v4477_v63, %v4954_v37  ;;  %v2135_v20 = vsel %vm806_vm2, %v2051_v15, 0.0 }
 0x2cd   :  { %v2193_v25 = vadd.f32 %v2192_v18, %v2191_v57  ;;  %v2130_v57 = vadd.f32 %v2129_v9, %v2128_v12  ;;  %v2202_v18 = vsel %vm806_vm2, %v2081_v40, 0.0  ;;  %v4956_v29 = vmax.f32 %v4955_v27, 0.0 }
 0x2ce   :  { %v2204_v2 = vsel %vm806_vm2, %v2082_v46, 0.0  ;;  %v2206_v38 = vsel %vm806_vm2, %v2083_v35, 0.0  ;;  %v2137_v62 = vsel %vm806_vm2, %v2052_v47, 0.0  ;;  %v4960_v50 = vmax.f32 %v4959_v6, 0.0  ;;  %v2018_v31 = vpop.permute.xlu0 %2017 }
 0x2cf   :  { %v2195_v4 = vadd.f32 %v2194_v58, %v2193_v25  ;;  %v1833_v5 = vpop.permute.xlu1 %1832  ;;  %v2132_v58 = vadd.f32 %v2131_v32, %v2130_v57  ;;  %v2053_v45 = vmul.f32 %v1828_v28, %v4956_v29  ;;  %v2208_v42 = vsel %vm806_vm2, %v2084_v17, 0.0  ;;  %v4961_v28 = vld [vmem:[#allocation40_spill] sm:$0xff]  ;;  %v4971_v57 = vld [vmem:[#allocation50_spill] sm:$0xff] }
 0x2d0   :  { %v2054_v14 = vmul.f32 %v1833_v5, %v4960_v50  ;;  %v4964_v40 = vmax.f32 %v4963_v56, 0.0  ;;  %v4965_v5 = vld [vmem:[#allocation43_spill] sm:$0xff]  ;;  %v4974_v49 = vmax.f32 %v4973_v13, 0.0 }
 0x2d1   :  { %v2197_v60 = vadd.f32 %v2196_v36, %v2195_v4  ;;  %v2134_v39 = vadd.f32 %v2133_v19, %v2132_v58  ;;  %v4957_v4 = vld [vmem:[#allocation34_spill] sm:$0xff]  ;;  %v2139_v48 = vsel %vm806_vm2, %v2053_v45, 0.0  ;;  %v4966_v52 = vmax.f32 %v4965_v5, 0.0  ;;  %v4975_v58 = vld [vmem:[#allocation55_spill] sm:$0xff] }
 0x2d2   :  { %v4958_v43 = vmax.f32 %v4957_v4, 0.0  ;;  %v2141_v12 = vsel %vm806_vm2, %v2054_v14, 0.0  ;;  %v2089_v47 = vmul.f32 %v4575_v53, %v4974_v49 }
 0x2d3   :  { %v2199_v8 = vadd.f32 %v2198_v26, %v2197_v60  ;;  %v1838_v59 = vpop.permute.xlu1 %1837  ;;  %v2136_v63 = vadd.f32 %v2135_v20, %v2134_v39  ;;  %v4962_v60 = vmax.f32 %v4961_v28, 0.0  ;;  %v4977_v20 = vld [vmem:[#allocation48_spill] sm:$0xff]  ;;  %v4979_v39 = vld [vmem:[#allocation59_spill] sm:$0xff] }
 0x2d4   :  { %v2085_v36 = vmul.f32 %v4493_v51, %v4958_v43  ;;  %v2055_v51 = vmul.f32 %v1838_v59, %v4964_v40  ;;  %v4970_v59 = vmax.f32 %v4969_v61, 0.0  ;;  %v4978_v27 = vmax.f32 %v4977_v20, 0.0 }
 0x2d5   :  { %v2201_v11 = vadd.f32 %v2200_v7, %v2199_v8  ;;  %v2086_v26 = vmul.f32 %v4506_v10, %v4962_v60  ;;  %v2138_v9 = vadd.f32 %v2137_v62, %v2136_v63  ;;  %v2087_v8 = vmul.f32 %v4529_v0, %v4966_v52  ;;  %v4967_v7 = vld [vmem:[#allocation45_spill] sm:$0xff]  ;;  %v2023_v0 = vpop.permute.xlu0 %2022 }
 0x2d6   :  { %v2210_v21 = vsel %vm806_vm2, %v2085_v36, 0.0  ;;  %v4968_v54 = vmax.f32 %v4967_v7, 0.0  ;;  %v2088_v15 = vmul.f32 %v4550_v24, %v4970_v59  ;;  %v2090_v29 = vmul.f32 %v2013_v33, %v4978_v27  ;;  %v4981_v36 = vld [vmem:[#allocation51_spill] sm:$0xff] }
 0x2d7   :  { %v2203_v16 = vadd.f32 %v2202_v18, %v2201_v11  ;;  %v1843_v25 = vpop.permute.xlu1 %1842  ;;  %v2140_v46 = vadd.f32 %v2139_v48, %v2138_v9  ;;  %v2212_v23 = vsel %vm806_vm2, %v2086_v26, 0.0  ;;  %v2143_v11 = vsel %vm806_vm2, %v2055_v51, 0.0  ;;  %v4985_v48 = vld [vmem:[#allocation54_spill] sm:$0xff] }
 0x2d8   :  { %v2056_v44 = vmul.f32 %v1843_v25, %v4968_v54  ;;  %v4972_v18 = vmax.f32 %v4971_v57, 0.0  ;;  %v2214_v19 = vsel %vm806_vm2, %v2087_v8, 0.0  ;;  %v4976_v25 = vmax.f32 %v4975_v58, 0.0 }
 0x2d9   :  { %v2205_v41 = vadd.f32 %v2204_v2, %v2203_v16  ;;  %v2142_v34 = vadd.f32 %v2141_v12, %v2140_v46  ;;  %v2216_v17 = vsel %vm806_vm2, %v2088_v15, 0.0  ;;  %v2218_v43 = vsel %vm806_vm2, %v2089_v47, 0.0  ;;  %v2028_v14 = vpop.permute.xlu0 %2027 }
 0x2da   :  { %v2145_v16 = vsel %vm806_vm2, %v2056_v44, 0.0  ;;  %v4982_v62 = vmax.f32 %v4981_v36, 0.0  ;;  %v2220_v33 = vsel %vm806_vm2, %v2090_v29, 0.0  ;;  %v4986_v56 = vmax.f32 %v4985_v48, 0.0  ;;  %v4989_v44 = vld [vmem:[#allocation57_spill] sm:$0xff] }
 0x2db   :  { %v1848_v22 = vpop.permute.xlu1 %1847  ;;  %v2207_v1 = vadd.f32 %v2206_v38, %v2205_v41  ;;  %v2144_v24 = vadd.f32 %v2143_v11, %v2142_v34  ;;  %v4980_v41 = vmax.f32 %v4979_v39, 0.0  ;;  %v4990_v46 = vmax.f32 %v4989_v44, 0.0 }
 0x2dc   :  { %v2057_v30 = vmul.f32 %v1848_v22, %v4972_v18  ;;  %v2091_v6 = vmul.f32 %v2018_v31, %v4982_v62 }
 0x2dd   :  { %v2209_v3 = vadd.f32 %v2208_v42, %v2207_v1  ;;  %v2146_v4 = vadd.f32 %v2145_v16, %v2144_v24  ;;  %v4983_v42 = vld [vmem:[#allocation46_spill] sm:$0xff] }
 0x2de   :  { %v2147_v45 = vsel %vm806_vm2, %v2057_v30, 0.0  ;;  %v4984_v28 = vmax.f32 %v4983_v42, 0.0  ;;  %v2222_v31 = vsel %vm806_vm2, %v2091_v6, 0.0 }
 0x2df   :  { %v1853_v10 = vpop.permute.xlu1 %1852  ;;  %v2211_v32 = vadd.f32 %v2210_v21, %v2209_v3  ;;  %v2148_v63 = vadd.f32 %v2147_v45, %v2146_v4  ;;  %v4987_v3 = vld [vmem:[#allocation49_spill] sm:$0xff] }
 0x2e0   :  { %v2058_v2 = vmul.f32 %v1853_v10, %v4976_v25  ;;  %v2092_v60 = vmul.f32 %v2023_v0, %v4984_v28  ;;  %v4988_v21 = vmax.f32 %v4987_v3, 0.0 }
 0x2e1   :  { %v2213_v35 = vadd.f32 %v2212_v23, %v2211_v32 }
 0x2e2   :  { %v2149_v50 = vsel %vm806_vm2, %v2058_v2, 0.0  ;;  %v2093_v5 = vmul.f32 %v2028_v14, %v4988_v21  ;;  %v2224_v54 = vsel %vm806_vm2, %v2092_v60, 0.0 }
 0x2e3   :  { %v1858_v55 = vpop.permute.xlu1 %1857  ;;  %v2215_v37 = vadd.f32 %v2214_v19, %v2213_v35  ;;  %v2150_v51 = vadd.f32 %v2149_v50, %v2148_v63 }
 0x2e4   :  { %v2059_v38 = vmul.f32 %v1858_v55, %v4980_v41  ;;  %v2226_v61 = vsel %vm806_vm2, %v2093_v5, 0.0  ;;  %v2417_v55 = vld [vmem:[%s4696_s6] ss:$0 sm:$0xff]  ;;  %s2857_s6 = scalar_lea.vmem %s2340_s9, 32 }
 0x2e5   :  { %v2217_v53 = vadd.f32 %v2216_v17, %v2215_v37  ;;  %p2858_p0 = scmp.ne.s32.totalorder %s2340_s9, %s2857_s6  ;;  %p2863_p2 = scmp.lt.s32.totalorder %s2857_s6, %s2857_s6 }
 0x2e6   :  { %v2151_v26 = vsel %vm806_vm2, %v2059_v38, 0.0 }
 0x2e7   :  { %v1863_v22 = vpop.permute.xlu1 %1862  ;;  %v2219_v1 = vadd.f32 %v2218_v43, %v2217_v53  ;;  %v2152_v8 = vadd.f32 %v2151_v26, %v2150_v51  ;;  %p2864_p3 = por %p2863_p2, %p2862_p1 }
 0x2e8   :  { %v2060_v40 = vmul.f32 %v1863_v22, %v4986_v56 }
 0x2e9   :  { %v2221_v9 = vadd.f32 %v2220_v33, %v2219_v1  ;;  %p2865_p4 = pnand %p2864_p3, %p2858_p0 }
 0x2ea   :  { %v2153_v52 = vsel %vm806_vm2, %v2060_v40, 0.0 }
 0x2eb   :  { %v1868_v12 = vpop.permute.xlu1 %1867  ;;  %v2223_v7 = vadd.f32 %v2222_v31, %v2221_v9  ;;  %v2154_v32 = vadd.f32 %v2153_v52, %v2152_v8 }
 0x2ec   :  { %v2061_v10 = vmul.f32 %v1868_v12, %v4990_v46 }
 0x2ed   :  { %v2225_v23 = vadd.f32 %v2224_v54, %v2223_v7 }
 0x2ee   :  { %v2155_v59 = vsel %vm806_vm2, %v2061_v10, 0.0 }
 0x2ef   :  { %v2156_v15 = vadd.f32 %v2155_v59, %v2154_v32  ;;  %v2227_v11 = vadd.f32 %v2226_v61, %v2225_v23 }
 0x2f1   :  { %v2157_v57 = vrot.slane %v2156_v15, 4  ;;  %v2228_v18 = vrot.slane %v2227_v11, 4 }
 0x2f3   :  { %v2158_v30 = vadd.f32 %v2157_v57, %v2156_v15  ;;  %v2229_v0 = vadd.f32 %v2228_v18, %v2227_v11 }
 0x2f5   :  { %v2159_v34 = vrot.slane %v2158_v30, 2  ;;  %v2230_v35 = vrot.slane %v2229_v0, 2 }
 0x2f7   :  { %v2160_v19 = vadd.f32 %v2159_v34, %v2158_v30  ;;  %v2231_v13 = vadd.f32 %v2230_v35, %v2229_v0 }
 0x2f9   :  { %v2161_v49 = vrot.slane %v2160_v19, 1  ;;  %v2232_v47 = vrot.slane %v2231_v13, 1 }
 0x2fb   :  { %v2162_v16 = vadd.f32 %v2161_v49, %v2160_v19  ;;  %v2233_v58 = vadd.f32 %v2232_v47, %v2231_v13 }
 0x2fd   :  { %v2164_v25 = vmul.f32 0.00390625, %v2162_v16  ;;  %v2234_v2 = vmul.f32 0.00390625, %v2233_v58 }
 0x2ff   :  { %v2236_v24 = vsel %vm2235_vm12, %v2164_v25, %v2234_v2 }
 0x300   :  { %2538 = vmatmul.mubr.msk.f32.vlgmr.msra.gmra.mrb[28].mxu1 %vm806_vm2, %v2236_v24 }
 0x3d3   :  { %v2317_v37 = vpop.f32.mrb[28].mxu1 }
 0x3d4   :  { %v2318_v17 = vadd.f32 %v2417_v55, %v2317_v37  ;;  %v2539_v20 = vpop.f32.mrb[29].mxu1 }
 0x3d6   :  { %v2321_v27 = vsel %vm378_vm1, %v2318_v17, -inf }
 0x3d7   :  { %2322 = vmax.xlane.f32.xlu1 %v2321_v27 }
 0x464   :  { %v2323_v29 = vpop.xlane.xlu1 %2322 }
 0x465   :  { %v2324_v45 = vsub.f32 %v2318_v17, %v2323_v29 }
 0x467   :  { %v2325_v39 = vmul.f32 1.442695, %v2324_v45 }
 0x469   :  { %2852 = vpow2.f32 %v2325_v39 }
 0x473   :  { %v2853_v41 = vpop.eup %2852 }
 0x474   :  { %v2327_v38 = vsel %vm378_vm1, %v2853_v41, 0.0 }
 0x475   :  { %2328 = vadd.xlane.f32.xlu0 %v2327_v38 }
 0x502   :  { %v2329_v4 = vpop.xlane.xlu0 %2328 }
 0x503   :  { %2854 = vrcp.f32 %v2329_v4 }
 0x50d   :  { %v2855_v53 = vpop.eup %2854 }
 0x50e   :  { %v2331_v43 = vmul.f32 %v2855_v53, %v2853_v41 }
 0x510   :  { %2332 = vst [vmem:[#allocation3] sm:$0x3] %v2331_v43 }
 0x511   :  { %2868 = shalt.err (!%p2865_p4)
}
 0x512   :  { %s2869_s11 = scalar_lea.hbm %s4697_s7, 32 }
 0x513   :  { %p2870_p5 = scmp.ne.s32.totalorder %s4697_s7, %s2869_s11  ;;  %p2873_p6 = scmp.lt.u32.totalorder %s2869_s11, %s4697_s7 }
 0x515   :  { %p2875_p7 = pnand %p2873_p6, %p2870_p5 }
 0x517   :  { %2878 = shalt.err (!%p2875_p7)
}
 0x518   :  { %2342 = dma.vmem_to_hbm [thread:$0]  %s2340_s9, 32, %s4697_s7, [#allocation4]  }
 0x519   :  { %2879 = dma.done.wait [#allocation4], 32  }
 0x51a   :  { %2880 = vsyncadd [#allocation4], 4294967264 }
 0x51b   :  { %2346 = vsyncpa [#allocation4], 1 }

</bundles_post_ra>
